<compile_context>
chip_gen: v6e
topology: v6e:2x2x1
jax: 0.10.0
libtpu: 0.0.40
codegen_flags: <defaults>
</compile_context>

<pallas_src>
import functools
import math

import numpy as np

import jax
import jax.numpy as jnp
from jax.experimental import pallas as pl
from jax.experimental.pallas import tpu as pltpu

_LANES = 128


def _round_up(x, m):
    return (x + m - 1) // m * m


def _largest_divisor_leq(n, cap):
    cap = max(1, min(cap, n))
    for d in range(cap, 0, -1):
        if n % d == 0:
            return d
    return 1


def _nbytes(shape, dtype):
    return math.prod(int(d) for d in shape) * np.dtype(dtype).itemsize


# ------------------------------- Pallas kernel ------------------------------ #

def _conv_block_kernel(img_ref, w_ref, scale_ref, bias_ref, *rest,
                       conv_stride, shortcut, merge_taps):
    """One (batch, row-block) step of: 3x3 conv + BN (+ shortcut + add) + ReLU.

    img_ref   : (1, Ho, s*s, Wo, Cin)  phase-split conv input (whole image)
    w_ref     : (3, 3*Cin, Cout) or (3, 3, Cin, Cout)   conv weights (mxu dtype)
    scale/bias: (1, Cout)              folded BatchNorm scale / bias (f32)
    shortcut inputs (optional)         x at stride-phase (0,0) (+ 1x1 proj params)
    o_ref     : (1, TH, Wo, Cout)      output row block
    xp_ref    : (TH+2, s*s, Wo+2, Cin) VMEM scratch: halo-padded input slab
    acc_ref   : (TH*Wo, Cout) f32      VMEM scratch: matmul accumulator
    """
    if shortcut == "proj":
        scx_ref, ws_ref, ss_ref, bs_ref, o_ref, xp_ref, acc_ref = rest
    elif shortcut == "identity":
        scx_ref, o_ref, xp_ref, acc_ref = rest
        ws_ref = ss_ref = bs_ref = None
    else:
        o_ref, xp_ref, acc_ref = rest
        scx_ref = ws_ref = ss_ref = bs_ref = None

    TH, Wo, Cout = o_ref.shape[1], o_ref.shape[2], o_ref.shape[3]
    Cin = img_ref.shape[-1]
    s = conv_stride
    ss = xp_ref.shape[1]                 # = s * s stride phases
    dt = xp_ref.dtype
    f32 = jnp.float32

    rb = pl.program_id(1)
    nrb = pl.num_programs(1)
    r0 = pl.multiple_of(TH * rb, TH)

    # ---- build the halo-padded input slab: zero ONLY the halo strips ---------
    # W-halo columns (always zero; also covers the corner cells of the H halo).
    xp_ref[:, :, 0:1, :] = jnp.zeros((TH + 2, ss, 1, Cin), dt)
    xp_ref[:, :, Wo + 1:Wo + 2, :] = jnp.zeros((TH + 2, ss, 1, Cin), dt)

    # interior rows of this row block
    xp_ref[1:TH + 1, :, 1:Wo + 1, :] = (
        img_ref[0, pl.ds(r0, TH), :, :, :].astype(dt))

    # top halo row-group: zero at the image top, neighbour rows otherwise
    @pl.when(rb == 0)
    def _():
        xp_ref[0:1, :, 1:Wo + 1, :] = jnp.zeros((1, ss, Wo, Cin), dt)

    @pl.when(rb > 0)
    def _():
        xp_ref[0:1, :, 1:Wo + 1, :] = (
            img_ref[0, pl.ds(r0 - 1, 1), :, :, :].astype(dt))

    # bottom halo row-group: zero at the image bottom, neighbour rows otherwise
    @pl.when(rb == nrb - 1)
    def _():
        xp_ref[TH + 1:TH + 2, :, 1:Wo + 1, :] = jnp.zeros((1, ss, Wo, Cin), dt)

    @pl.when(rb < nrb - 1)
    def _():
        xp_ref[TH + 1:TH + 2, :, 1:Wo + 1, :] = (
            img_ref[0, pl.ds(r0 + TH, 1), :, :, :].astype(dt))

    # ---- 3x3 conv on the MXU --------------------------------------------------
    def tap(dy, dx):
        de, ph = divmod(dy - 1, s)       # slab row offset / row phase
        dc, pw = divmod(dx - 1, s)       # slab col offset / col phase
        return xp_ref[1 + de:1 + de + TH, ph * s + pw, 1 + dc:1 + dc + Wo, :]

    if merge_taps:
        # K-merged: one matmul per kernel row, K = 3*Cin (Cin % 128 == 0, so the
        # channel concat is lane-aligned). Accumulator init folded into dy==0.
        for dy in range(3):
            t = jnp.concatenate([tap(dy, 0), tap(dy, 1), tap(dy, 2)],
                                axis=-1).reshape(TH * Wo, 3 * Cin)
            d = jnp.dot(t, w_ref[dy], preferred_element_type=f32)
            if dy == 0:
                acc_ref[...] = d
            else:
                acc_ref[...] += d
    else:
        # small / unaligned Cin: 9 accumulated matmuls, init folded into tap 0.
        first = True
        for dy in range(3):
            for dx in range(3):
                t = tap(dy, dx).reshape(TH * Wo, Cin)
                d = jnp.dot(t, w_ref[dy, dx], preferred_element_type=f32)
                if first:
                    acc_ref[...] = d
                    first = False
                else:
                    acc_ref[...] += d

    # ---- folded-BN epilogue (f32) ---------------------------------------------
    y = acc_ref[...].reshape(TH, Wo, Cout) * scale_ref[0] + bias_ref[0]

    # ---- fused shortcut branch + residual add ---------------------------------
    Csc = None
    if shortcut != "none":
        xs = scx_ref[0, pl.ds(r0, TH), :, :]      # (TH, Wo, Csc)  stride phase (0,0)
        Csc = xs.shape[-1]
    if shortcut == "proj":                        # 1x1 conv (stride s) + folded BN
        sc = jnp.dot(xs.reshape(TH * Wo, Csc).astype(ws_ref.dtype), ws_ref[...],
                     preferred_element_type=f32).reshape(TH, Wo, Cout)
        y = y + sc * ss_ref[0] + bs_ref[0]
    elif shortcut == "identity" and Csc == Cout:
        y = y + xs.astype(f32)

    o_ref[0] = jnp.maximum(y, 0.0).astype(o_ref.dtype)

    if shortcut == "identity" and Csc < Cout:
        # Residual only touches the first Csc (real) output channels; the
        # lane-padding channels keep their value (sliced off outside).
        res = jnp.maximum(y[..., :Csc] + xs.astype(f32), 0.0)
        o_ref[0, :, :, 0:Csc] = res.astype(o_ref.dtype)


# ------------------------------- host wrappers ------------------------------ #

def _phase_split(x_nhwc, s):
    """(N,H,W,C) -> (N, H//s, s*s, W//s, C), grouping the s x s stride phases.

    Free reshape for s == 1; a single cheap relayout for s > 1 that lets the
    kernel read every strided 3x3 tap as a contiguous, statically-indexed
    slice."""
    N, H, W, C = x_nhwc.shape
    assert H % s == 0 and W % s == 0, (x_nhwc.shape, s)
    x = x_nhwc.reshape(N, H // s, s, W // s, s, C)
    x = jnp.transpose(x, (0, 1, 2, 4, 3, 5))
    return x.reshape(N, H // s, s * s, W // s, C)


def fused_conv3x3_bn_relu(img_ps, w_hwio, scale, bias, *, conv_stride, row_block,
                          mxu_dtype, shortcut="none", sc_img=None, sc_proj=None,
                          out_dtype=None, vmem_limit_bytes=None):
    """3x3 conv (+folded BN, + optional fused shortcut/residual) + ReLU."""
    N, Ho, ss, Wo, Cin = img_ps.shape
    assert ss == conv_stride * conv_stride, (ss, conv_stride)
    assert w_hwio.shape[:3] == (3, 3, Cin), (w_hwio.shape, Cin)
    Cout = w_hwio.shape[-1]
    TH = _largest_divisor_leq(Ho, row_block)
    nrb = Ho // TH
    out_dtype = img_ps.dtype if out_dtype is None else out_dtype

    # merge the 3 column taps of each kernel row into one K=3*Cin matmul when
    # the concat along channels is lane-aligned (Cin a multiple of 128).
    merge_taps = (Cin % _LANES == 0)

    w = w_hwio.astype(mxu_dtype)
    w_kern = w.reshape(3, 3 * Cin, Cout) if merge_taps else w
    sc2 = scale.reshape(1, Cout).astype(jnp.float32)
    bi2 = bias.reshape(1, Cout).astype(jnp.float32)

    in_specs = [
        pl.BlockSpec((1, Ho, ss, Wo, Cin), lambda n, r: (n, 0, 0, 0, 0)),
        pl.BlockSpec(tuple(w_kern.shape), lambda n, r: (0,) * w_kern.ndim),
        pl.BlockSpec((1, Cout), lambda n, r: (0, 0)),
        pl.BlockSpec((1, Cout), lambda n, r: (0, 0)),
    ]
    args = [img_ps, w_kern, sc2, bi2]
    in_block_bytes = (_nbytes((1, Ho, ss, Wo, Cin), img_ps.dtype)
                      + _nbytes(w_kern.shape, mxu_dtype)
                      + 2 * _nbytes((1, Cout), jnp.float32))

    if shortcut != "none":
        Nsc, Hsc, Wsc, Csc = sc_img.shape
        assert (Nsc, Hsc, Wsc) == (N, Ho, Wo), (sc_img.shape, N, Ho, Wo)
        in_specs.append(
            pl.BlockSpec((1, Ho, Wo, Csc), lambda n, r: (n, 0, 0, 0)))
        args.append(sc_img)
        in_block_bytes += _nbytes((1, Ho, Wo, Csc), sc_img.dtype)
    if shortcut == "proj":
        ws, s_s, b_s = sc_proj
        in_specs += [
            pl.BlockSpec(tuple(ws.shape), lambda n, r: (0, 0)),
            pl.BlockSpec((1, Cout), lambda n, r: (0, 0)),
            pl.BlockSpec((1, Cout), lambda n, r: (0, 0)),
        ]
        args += [ws.astype(mxu_dtype),
                 s_s.reshape(1, Cout).astype(jnp.float32),
                 b_s.reshape(1, Cout).astype(jnp.float32)]
        in_block_bytes += (_nbytes(ws.shape, mxu_dtype)
                           + 2 * _nbytes((1, Cout), jnp.float32))

    # size the VMEM limit from the actual footprint (double-buffered blocks +
    # scratch) with headroom; clamp to the 64 MiB v7x per-TC budget.
    scratch_bytes = (_nbytes((TH + 2, ss, Wo + 2, Cin), mxu_dtype)
                     + _nbytes((TH * Wo, Cout), jnp.float32))
    out_block_bytes = _nbytes((1, TH, Wo, Cout), out_dtype)
    if vmem_limit_bytes is None:
        need = 2 * (in_block_bytes + out_block_bytes) + scratch_bytes
        vmem_limit_bytes = int(min(max(2 * need, 32 << 20), 64 << 20))

    kernel = functools.partial(_conv_block_kernel, conv_stride=conv_stride,
                               shortcut=shortcut, merge_taps=merge_taps)

    return pl.pallas_call(
        kernel,
        out_shape=jax.ShapeDtypeStruct((N, Ho, Wo, Cout), out_dtype),
        grid=(N, nrb),
        in_specs=in_specs,
        out_specs=pl.BlockSpec((1, TH, Wo, Cout), lambda n, r: (n, r, 0, 0)),
        scratch_shapes=[
            pltpu.VMEM((TH + 2, ss, Wo + 2, Cin), mxu_dtype),  # halo slab
            pltpu.VMEM((TH * Wo, Cout), jnp.float32),          # matmul accumulator
        ],
        compiler_params=pltpu.CompilerParams(
            dimension_semantics=("parallel", "parallel"),
            vmem_limit_bytes=vmem_limit_bytes),
    )(*args)


def _fold_bn(gamma, beta, mean, var, conv_bias, eps=1e-5):
    inv = gamma / jnp.sqrt(var + eps)
    return inv, beta + inv * (conv_bias - mean)


def basic_block_forward(x_nchw, p, stride, *, row_block=32, mxu_dtype=jnp.bfloat16):
    """Pallas BasicBlock forward. x: (N, Cin, H, W) -> (N, Cout, H//s, W//s)."""
    N, Cin, H, W = x_nchw.shape
    Cout = p["w1"].shape[-1]
    Cout_p = _round_up(Cout, _LANES)      # lane-dense stores / matmul output dim
    dpad = Cout_p - Cout

    # NCHW -> NHWC (channels on TPU lanes).
    x = jnp.transpose(x_nchw, (0, 2, 3, 1))
    x_ps = _phase_split(x, stride)

    # zero-pad output channels (and conv2's matching input channels) to 128 lanes
    w1 = jnp.pad(p["w1"], ((0, 0), (0, 0), (0, 0), (0, dpad)))
    w2 = jnp.pad(p["w2"], ((0, 0), (0, 0), (0, dpad), (0, dpad)))
    s1 = jnp.pad(p["scale1"], (0, dpad))
    b1 = jnp.pad(p["bias1"], (0, dpad))
    s2 = jnp.pad(p["scale2"], (0, dpad))
    b2 = jnp.pad(p["bias2"], (0, dpad))

    # kernel A: conv3x3(stride) + BN1 + ReLU
    y1 = fused_conv3x3_bn_relu(x_ps, w1, s1, b1, conv_stride=stride,
                               row_block=row_block, mxu_dtype=mxu_dtype,
                               out_dtype=mxu_dtype)
    y1_ps = _phase_split(y1, 1)           # free reshape (stride 1)

    # shortcut input: only stride-phase (0,0) of x (the kernel reads nothing else)
    sc_img = x if stride == 1 else x[:, ::stride, ::stride, :]

    # kernel B: conv3x3(1) + BN2 + shortcut (+1x1 conv/BN) + residual add + ReLU
    if p["ws"] is not None:
        sc_proj = (jnp.pad(p["ws"], ((0, 0), (0, dpad))),
                   jnp.pad(p["scale_s"], (0, dpad)),
                   jnp.pad(p["bias_s"], (0, dpad)))
        out = fused_conv3x3_bn_relu(y1_ps, w2, s2, b2, conv_stride=1,
                                    row_block=row_block, mxu_dtype=mxu_dtype,
                                    shortcut="proj", sc_img=sc_img,
                                    sc_proj=sc_proj, out_dtype=x.dtype)
    else:
        assert stride == 1 and Cin == Cout
        out = fused_conv3x3_bn_relu(y1_ps, w2, s2, b2, conv_stride=1,
                                    row_block=row_block, mxu_dtype=mxu_dtype,
                                    shortcut="identity", sc_img=sc_img,
                                    out_dtype=x.dtype)

    out = out[..., :Cout]                 # drop lane padding
    return jnp.transpose(out, (0, 3, 1, 2))   # NHWC -> NCHW


# ------------------------- pure-JAX reference (check) ----------------------- #

def ref_basic_block(x, raw, stride, eps=1e-5):
    def conv(x, w, b, s, pad):
        y = jax.lax.conv_general_dilated(
            x, w, (s, s), [(pad, pad), (pad, pad)],
            dimension_numbers=("NCHW", "OIHW", "NCHW"))
        return y + b[None, :, None, None]

    def bn(x, g, be, m, v):
        inv = g / jnp.sqrt(v + eps)
        return x * inv[None, :, None, None] + (be - m * inv)[None, :, None, None]

    out = jnp.maximum(bn(conv(x, raw["w1"], raw["b1"], stride, 1), *raw["bn1"]), 0.0)
    out = bn(conv(out, raw["w2"], raw["b2"], 1, 1), *raw["bn2"])
    if raw["ws"] is not None:
        sc = bn(conv(x, raw["ws"], raw["bs"], stride, 0), *raw["bns"])
    else:
        sc = x
    return jnp.maximum(out + sc, 0.0)


# ----------------------------------- main ----------------------------------- #

if __name__ == "__main__":
    def bn_params(k, c):
        k1, k2, k3, k4 = jax.random.split(k, 4)
        gamma = 1.0 + 0.2 * jax.random.normal(k1, (c,), jnp.float32)
        beta = 0.1 * jax.random.normal(k2, (c,), jnp.float32)
        mean = 0.1 * jax.random.normal(k3, (c,), jnp.float32)
        var = 0.5 + jax.random.uniform(k4, (c,), jnp.float32)
        return gamma, beta, mean, var

    def make_raw(key, cin, cout, with_proj):
        ks = jax.random.split(key, 9)
        raw = {
            "w1": 0.2 * jax.random.normal(ks[0], (cout, cin, 3, 3), jnp.float32),
            "b1": 0.1 * jax.random.normal(ks[1], (cout,), jnp.float32),
            "bn1": bn_params(ks[2], cout),
            "w2": 0.2 * jax.random.normal(ks[3], (cout, cout, 3, 3), jnp.float32),
            "b2": 0.1 * jax.random.normal(ks[4], (cout,), jnp.float32),
            "bn2": bn_params(ks[5], cout),
            "ws": None, "bs": None, "bns": None,
        }
        if with_proj:
            raw["ws"] = 0.2 * jax.random.normal(ks[6], (cout, cin, 1, 1), jnp.float32)
            raw["bs"] = 0.1 * jax.random.normal(ks[7], (cout,), jnp.float32)
            raw["bns"] = bn_params(ks[8], cout)
        return raw

    def fold_params(raw):
        s1, b1 = _fold_bn(*raw["bn1"], raw["b1"])
        s2, b2 = _fold_bn(*raw["bn2"], raw["b2"])
        p = {
            "w1": jnp.transpose(raw["w1"], (2, 3, 1, 0)),   # OIHW -> HWIO
            "scale1": s1, "bias1": b1,
            "w2": jnp.transpose(raw["w2"], (2, 3, 1, 0)),
            "scale2": s2, "bias2": b2,
            "ws": None, "scale_s": None, "bias_s": None,
        }
        if raw["ws"] is not None:
            ss, bs = _fold_bn(*raw["bns"], raw["bs"])
            cout, cin = raw["ws"].shape[0], raw["ws"].shape[1]
            p["ws"] = jnp.transpose(raw["ws"], (2, 3, 1, 0)).reshape(cin, cout)
            p["scale_s"] = ss
            p["bias_s"] = bs
        return p

    key = jax.random.PRNGKey(0)
    kx, kp1, kp2, kp3 = jax.random.split(key, 4)
    N, H, W = 2, 16, 16

    # (name, Cin, Cout, stride, row_block, mxu dtype, atol, rtol, key)
    # rb=4/8 cases exercise the interior-halo row copies; rb=32 exercises the
    # single-row-block (both edges) path. Error bound: atol + rtol*max|ref|.
    cases = [
        ("stride1_proj_f32_rb4", 4, 8, 1, 4, jnp.float32, 1e-2, 0.0, kp1),
        ("stride1_proj_bf16", 4, 8, 1, 32, jnp.bfloat16, 5e-2, 3e-2, kp1),
        ("stride2_proj_f32", 4, 8, 2, 32, jnp.float32, 1e-2, 0.0, kp2),
        ("stride1_identity_f32", 8, 8, 1, 8, jnp.float32, 1e-2, 0.0, kp3),
    ]

    for name, cin, cout, stride, rblk, mxu, atol, rtol, pkey in cases:
        with_proj = (stride != 1) or (cin != cout)
        raw = make_raw(pkey, cin, cout, with_proj)
        params = fold_params(raw)
        x = jax.random.normal(kx, (N, cin, H, W), jnp.float32)

        out = jax.block_until_ready(
            basic_block_forward(x, params, stride, row_block=rblk, mxu_dtype=mxu))
        ref = jax.block_until_ready(ref_basic_block(x, raw, stride))

        assert out.shape == ref.shape, (name, out.shape, ref.shape)
        err = float(jnp.max(jnp.abs(out - ref)))
        bound = atol + rtol * float(jnp.max(jnp.abs(ref)))
        assert err < bound, f"{name}: max abs error {err} >= {bound}"

    print("KERNEL_OK")
</pallas_src>

<mosaic_0001>
module attributes {stable_mosaic.version = 11 : i64} {
  func.func @_conv_block_kernel(%arg0: i32, %arg1: i32, %arg2: memref<1x16x1x16x4xf32, #tpu.memory_space<vmem>>, %arg3: memref<3x3x4x128xf32, #tpu.memory_space<vmem>>, %arg4: memref<1x128xf32, #tpu.memory_space<vmem>>, %arg5: memref<1x128xf32, #tpu.memory_space<vmem>>, %arg6: memref<1x4x16x128xf32, #tpu.memory_space<vmem>>, %arg7: memref<6x1x18x4xf32, #tpu.memory_space<vmem>>, %arg8: memref<64x128xf32, #tpu.memory_space<vmem>>) attributes {dimension_semantics = [#tpu.dimension_semantics<parallel>, #tpu.dimension_semantics<parallel>], iteration_bounds = array<i64: 2, 4>, scalar_prefetch = 0 : i64, scratch_operands = 2 : i64, tpu.core_type = #tpu.core_type<tc>, window_params = [{transform_indices = @transform_0, window_bounds = array<i64: 1, 16, 1, 16, 4>}, {pipeline_mode = #tpu.pipeline_mode<synchronous>, transform_indices = @transform_1, window_bounds = array<i64: 3, 3, 4, 128>}, {pipeline_mode = #tpu.pipeline_mode<synchronous>, transform_indices = @transform_2, window_bounds = array<i64: 1, 128>}, {pipeline_mode = #tpu.pipeline_mode<synchronous>, transform_indices = @transform_3, window_bounds = array<i64: 1, 128>}, {transform_indices = @transform_4, window_bounds = array<i64: 1, 4, 16, 128>}]} {
    %c4_i32 = arith.constant 4 : i32
    %0 = arith.muli %c4_i32, %arg1 : i32
    %1 = tpu.assume_multiple %0, 4 : i32
    %cst = arith.constant 0.000000e+00 : f32
    %2 = vector.broadcast %cst : f32 to vector<6x1x1x4xf32>
    %c0 = arith.constant 0 : index
    %c0_0 = arith.constant 0 : index
    %c0_1 = arith.constant 0 : index
    %c0_2 = arith.constant 0 : index
    %3 = vector.load %arg7[%c0, %c0_0, %c0_1, %c0_2] : memref<6x1x18x4xf32, #tpu.memory_space<vmem>>, vector<6x1x1x4xf32>
    tpu.vector_store %arg7[%c0, %c0_0, %c0_1, %c0_2], %2 {strides = array<i32>} : memref<6x1x18x4xf32, #tpu.memory_space<vmem>>, vector<6x1x1x4xf32>,
    %cst_3 = arith.constant 0.000000e+00 : f32
    %4 = vector.broadcast %cst_3 : f32 to vector<6x1x1x4xf32>
    %c0_4 = arith.constant 0 : index
    %c0_5 = arith.constant 0 : index
    %c17 = arith.constant 17 : index
    %c0_6 = arith.constant 0 : index
    %5 = vector.load %arg7[%c0_4, %c0_5, %c17, %c0_6] : memref<6x1x18x4xf32, #tpu.memory_space<vmem>>, vector<6x1x1x4xf32>
    tpu.vector_store %arg7[%c0_4, %c0_5, %c17, %c0_6], %4 {strides = array<i32>} : memref<6x1x18x4xf32, #tpu.memory_space<vmem>>, vector<6x1x1x4xf32>,
    %c0_7 = arith.constant 0 : index
    %6 = arith.index_cast %1 : i32 to index
    %c0_8 = arith.constant 0 : index
    %c0_9 = arith.constant 0 : index
    %c0_10 = arith.constant 0 : index
    %7 = vector.load %arg2[%c0_7, %6, %c0_8, %c0_9, %c0_10] : memref<1x16x1x16x4xf32, #tpu.memory_space<vmem>>, vector<1x4x1x16x4xf32>
    %8 = vector.shape_cast %7 : vector<1x4x1x16x4xf32> to vector<4x1x16x4xf32>
    %c1 = arith.constant 1 : index
    %c0_11 = arith.constant 0 : index
    %c1_12 = arith.constant 1 : index
    %c0_13 = arith.constant 0 : index
    %9 = vector.load %arg7[%c1, %c0_11, %c1_12, %c0_13] : memref<6x1x18x4xf32, #tpu.memory_space<vmem>>, vector<4x1x16x4xf32>
    tpu.vector_store %arg7[%c1, %c0_11, %c1_12, %c0_13], %8 {strides = array<i32>} : memref<6x1x18x4xf32, #tpu.memory_space<vmem>>, vector<4x1x16x4xf32>,
    %c0_i32 = arith.constant 0 : i32
    %10 = arith.cmpi eq, %arg1, %c0_i32 : i32
    %11 = arith.extui %10 : i1 to i32
    %c0_i32_14 = arith.constant 0 : i32
    %12 = arith.cmpi ne, %11, %c0_i32_14 : i32
    scf.if %12 {
      %cst_145 = arith.constant 0.000000e+00 : f32
      %118 = vector.broadcast %cst_145 : f32 to vector<1x1x16x4xf32>
      %c0_146 = arith.constant 0 : index
      %c0_147 = arith.constant 0 : index
      %c1_148 = arith.constant 1 : index
      %c0_149 = arith.constant 0 : index
      %119 = vector.load %arg7[%c0_146, %c0_147, %c1_148, %c0_149] : memref<6x1x18x4xf32, #tpu.memory_space<vmem>>, vector<1x1x16x4xf32>
      tpu.vector_store %arg7[%c0_146, %c0_147, %c1_148, %c0_149], %118 {strides = array<i32>} : memref<6x1x18x4xf32, #tpu.memory_space<vmem>>, vector<1x1x16x4xf32>,
    } else {
    }
    %c0_i32_15 = arith.constant 0 : i32
    %13 = arith.cmpi sgt, %arg1, %c0_i32_15 : i32
    %14 = arith.extui %13 : i1 to i32
    %c0_i32_16 = arith.constant 0 : i32
    %15 = arith.cmpi ne, %14, %c0_i32_16 : i32
    scf.if %15 {
      %c1_i32 = arith.constant 1 : i32
      %118 = arith.subi %1, %c1_i32 : i32
      %c0_145 = arith.constant 0 : index
      %119 = arith.index_cast %118 : i32 to index
      %c0_146 = arith.constant 0 : index
      %c0_147 = arith.constant 0 : index
      %c0_148 = arith.constant 0 : index
      %120 = vector.load %arg2[%c0_145, %119, %c0_146, %c0_147, %c0_148] : memref<1x16x1x16x4xf32, #tpu.memory_space<vmem>>, vector<1x1x1x16x4xf32>
      %121 = vector.shape_cast %120 : vector<1x1x1x16x4xf32> to vector<1x1x16x4xf32>
      %c0_149 = arith.constant 0 : index
      %c0_150 = arith.constant 0 : index
      %c1_151 = arith.constant 1 : index
      %c0_152 = arith.constant 0 : index
      %122 = vector.load %arg7[%c0_149, %c0_150, %c1_151, %c0_152] : memref<6x1x18x4xf32, #tpu.memory_space<vmem>>, vector<1x1x16x4xf32>
      tpu.vector_store %arg7[%c0_149, %c0_150, %c1_151, %c0_152], %121 {strides = array<i32>} : memref<6x1x18x4xf32, #tpu.memory_space<vmem>>, vector<1x1x16x4xf32>,
    } else {
    }
    %c3_i32 = arith.constant 3 : i32
    %16 = arith.cmpi eq, %arg1, %c3_i32 : i32
    %17 = arith.extui %16 : i1 to i32
    %c0_i32_17 = arith.constant 0 : i32
    %18 = arith.cmpi ne, %17, %c0_i32_17 : i32
    scf.if %18 {
      %cst_145 = arith.constant 0.000000e+00 : f32
      %118 = vector.broadcast %cst_145 : f32 to vector<1x1x16x4xf32>
      %c5 = arith.constant 5 : index
      %c0_146 = arith.constant 0 : index
      %c1_147 = arith.constant 1 : index
      %c0_148 = arith.constant 0 : index
      %119 = vector.load %arg7[%c5, %c0_146, %c1_147, %c0_148] : memref<6x1x18x4xf32, #tpu.memory_space<vmem>>, vector<1x1x16x4xf32>
      tpu.vector_store %arg7[%c5, %c0_146, %c1_147, %c0_148], %118 {strides = array<i32>} : memref<6x1x18x4xf32, #tpu.memory_space<vmem>>, vector<1x1x16x4xf32>,
    } else {
    }
    %c3_i32_18 = arith.constant 3 : i32
    %19 = arith.cmpi slt, %arg1, %c3_i32_18 : i32
    %20 = arith.extui %19 : i1 to i32
    %c0_i32_19 = arith.constant 0 : i32
    %21 = arith.cmpi ne, %20, %c0_i32_19 : i32
    scf.if %21 {
      %c4_i32_145 = arith.constant 4 : i32
      %118 = arith.addi %1, %c4_i32_145 : i32
      %c0_146 = arith.constant 0 : index
      %119 = arith.index_cast %118 : i32 to index
      %c0_147 = arith.constant 0 : index
      %c0_148 = arith.constant 0 : index
      %c0_149 = arith.constant 0 : index
      %120 = vector.load %arg2[%c0_146, %119, %c0_147, %c0_148, %c0_149] : memref<1x16x1x16x4xf32, #tpu.memory_space<vmem>>, vector<1x1x1x16x4xf32>
      %121 = vector.shape_cast %120 : vector<1x1x1x16x4xf32> to vector<1x1x16x4xf32>
      %c5 = arith.constant 5 : index
      %c0_150 = arith.constant 0 : index
      %c1_151 = arith.constant 1 : index
      %c0_152 = arith.constant 0 : index
      %122 = vector.load %arg7[%c5, %c0_150, %c1_151, %c0_152] : memref<6x1x18x4xf32, #tpu.memory_space<vmem>>, vector<1x1x16x4xf32>
      tpu.vector_store %arg7[%c5, %c0_150, %c1_151, %c0_152], %121 {strides = array<i32>} : memref<6x1x18x4xf32, #tpu.memory_space<vmem>>, vector<1x1x16x4xf32>,
    } else {
    }
    %c0_20 = arith.constant 0 : index
    %c0_21 = arith.constant 0 : index
    %c0_22 = arith.constant 0 : index
    %c0_23 = arith.constant 0 : index
    %22 = vector.load %arg7[%c0_20, %c0_21, %c0_22, %c0_23] : memref<6x1x18x4xf32, #tpu.memory_space<vmem>>, vector<4x1x16x4xf32>
    %23 = vector.shape_cast %22 : vector<4x1x16x4xf32> to vector<4x16x4xf32>
    %24 = vector.shape_cast %23 : vector<4x16x4xf32> to vector<64x4xf32>
    %c0_24 = arith.constant 0 : index
    %c0_25 = arith.constant 0 : index
    %c0_26 = arith.constant 0 : index
    %c0_27 = arith.constant 0 : index
    %25 = vector.load %arg3[%c0_24, %c0_25, %c0_26, %c0_27] : memref<3x3x4x128xf32, #tpu.memory_space<vmem>>, vector<1x1x4x128xf32>
    %26 = vector.shape_cast %25 : vector<1x1x4x128xf32> to vector<4x128xf32>
    %cst_28 = arith.constant dense<0.000000e+00> : vector<64x128xf32>
    %27 = tpu.matmul %24, %26, %cst_28 {dimension_numbers = #tpu.dot_dimension_numbers<[1], [0], [0], [1], [0, 0, 1, 1], [], []>} : vector<64x4xf32>, vector<4x128xf32>, vector<64x128xf32> -> vector<64x128xf32>
    %c0_29 = arith.constant 0 : index
    %c0_30 = arith.constant 0 : index
    %28 = vector.load %arg8[%c0_29, %c0_30] : memref<64x128xf32, #tpu.memory_space<vmem>>, vector<64x128xf32>
    tpu.vector_store %arg8[%c0_29, %c0_30], %27 {strides = array<i32>} : memref<64x128xf32, #tpu.memory_space<vmem>>, vector<64x128xf32>,
    %c0_31 = arith.constant 0 : index
    %c0_32 = arith.constant 0 : index
    %c1_33 = arith.constant 1 : index
    %c0_34 = arith.constant 0 : index
    %29 = vector.load %arg7[%c0_31, %c0_32, %c1_33, %c0_34] : memref<6x1x18x4xf32, #tpu.memory_space<vmem>>, vector<4x1x16x4xf32>
    %30 = vector.shape_cast %29 : vector<4x1x16x4xf32> to vector<4x16x4xf32>
    %31 = vector.shape_cast %30 : vector<4x16x4xf32> to vector<64x4xf32>
    %c0_35 = arith.constant 0 : index
    %c1_36 = arith.constant 1 : index
    %c0_37 = arith.constant 0 : index
    %c0_38 = arith.constant 0 : index
    %32 = vector.load %arg3[%c0_35, %c1_36, %c0_37, %c0_38] : memref<3x3x4x128xf32, #tpu.memory_space<vmem>>, vector<1x1x4x128xf32>
    %33 = vector.shape_cast %32 : vector<1x1x4x128xf32> to vector<4x128xf32>
    %cst_39 = arith.constant dense<0.000000e+00> : vector<64x128xf32>
    %34 = tpu.matmul %31, %33, %cst_39 {dimension_numbers = #tpu.dot_dimension_numbers<[1], [0], [0], [1], [0, 0, 1, 1], [], []>} : vector<64x4xf32>, vector<4x128xf32>, vector<64x128xf32> -> vector<64x128xf32>
    %c0_40 = arith.constant 0 : index
    %c0_41 = arith.constant 0 : index
    %35 = vector.load %arg8[%c0_40, %c0_41] : memref<64x128xf32, #tpu.memory_space<vmem>>, vector<64x128xf32>
    %36 = arith.addf %35, %34 : vector<64x128xf32>
    %c0_42 = arith.constant 0 : index
    %c0_43 = arith.constant 0 : index
    %37 = vector.load %arg8[%c0_42, %c0_43] : memref<64x128xf32, #tpu.memory_space<vmem>>, vector<64x128xf32>
    tpu.vector_store %arg8[%c0_42, %c0_43], %36 {strides = array<i32>} : memref<64x128xf32, #tpu.memory_space<vmem>>, vector<64x128xf32>,
    %c0_44 = arith.constant 0 : index
    %c0_45 = arith.constant 0 : index
    %c2 = arith.constant 2 : index
    %c0_46 = arith.constant 0 : index
    %38 = vector.load %arg7[%c0_44, %c0_45, %c2, %c0_46] : memref<6x1x18x4xf32, #tpu.memory_space<vmem>>, vector<4x1x16x4xf32>
    %39 = vector.shape_cast %38 : vector<4x1x16x4xf32> to vector<4x16x4xf32>
    %40 = vector.shape_cast %39 : vector<4x16x4xf32> to vector<64x4xf32>
    %c0_47 = arith.constant 0 : index
    %c2_48 = arith.constant 2 : index
    %c0_49 = arith.constant 0 : index
    %c0_50 = arith.constant 0 : index
    %41 = vector.load %arg3[%c0_47, %c2_48, %c0_49, %c0_50] : memref<3x3x4x128xf32, #tpu.memory_space<vmem>>, vector<1x1x4x128xf32>
    %42 = vector.shape_cast %41 : vector<1x1x4x128xf32> to vector<4x128xf32>
    %cst_51 = arith.constant dense<0.000000e+00> : vector<64x128xf32>
    %43 = tpu.matmul %40, %42, %cst_51 {dimension_numbers = #tpu.dot_dimension_numbers<[1], [0], [0], [1], [0, 0, 1, 1], [], []>} : vector<64x4xf32>, vector<4x128xf32>, vector<64x128xf32> -> vector<64x128xf32>
    %c0_52 = arith.constant 0 : index
    %c0_53 = arith.constant 0 : index
    %44 = vector.load %arg8[%c0_52, %c0_53] : memref<64x128xf32, #tpu.memory_space<vmem>>, vector<64x128xf32>
    %45 = arith.addf %44, %43 : vector<64x128xf32>
    %c0_54 = arith.constant 0 : index
    %c0_55 = arith.constant 0 : index
    %46 = vector.load %arg8[%c0_54, %c0_55] : memref<64x128xf32, #tpu.memory_space<vmem>>, vector<64x128xf32>
    tpu.vector_store %arg8[%c0_54, %c0_55], %45 {strides = array<i32>} : memref<64x128xf32, #tpu.memory_space<vmem>>, vector<64x128xf32>,
    %c1_56 = arith.constant 1 : index
    %c0_57 = arith.constant 0 : index
    %c0_58 = arith.constant 0 : index
    %c0_59 = arith.constant 0 : index
    %47 = vector.load %arg7[%c1_56, %c0_57, %c0_58, %c0_59] : memref<6x1x18x4xf32, #tpu.memory_space<vmem>>, vector<4x1x16x4xf32>
    %48 = vector.shape_cast %47 : vector<4x1x16x4xf32> to vector<4x16x4xf32>
    %49 = vector.shape_cast %48 : vector<4x16x4xf32> to vector<64x4xf32>
    %c1_60 = arith.constant 1 : index
    %c0_61 = arith.constant 0 : index
    %c0_62 = arith.constant 0 : index
    %c0_63 = arith.constant 0 : index
    %50 = vector.load %arg3[%c1_60, %c0_61, %c0_62, %c0_63] : memref<3x3x4x128xf32, #tpu.memory_space<vmem>>, vector<1x1x4x128xf32>
    %51 = vector.shape_cast %50 : vector<1x1x4x128xf32> to vector<4x128xf32>
    %cst_64 = arith.constant dense<0.000000e+00> : vector<64x128xf32>
    %52 = tpu.matmul %49, %51, %cst_64 {dimension_numbers = #tpu.dot_dimension_numbers<[1], [0], [0], [1], [0, 0, 1, 1], [], []>} : vector<64x4xf32>, vector<4x128xf32>, vector<64x128xf32> -> vector<64x128xf32>
    %c0_65 = arith.constant 0 : index
    %c0_66 = arith.constant 0 : index
    %53 = vector.load %arg8[%c0_65, %c0_66] : memref<64x128xf32, #tpu.memory_space<vmem>>, vector<64x128xf32>
    %54 = arith.addf %53, %52 : vector<64x128xf32>
    %c0_67 = arith.constant 0 : index
    %c0_68 = arith.constant 0 : index
    %55 = vector.load %arg8[%c0_67, %c0_68] : memref<64x128xf32, #tpu.memory_space<vmem>>, vector<64x128xf32>
    tpu.vector_store %arg8[%c0_67, %c0_68], %54 {strides = array<i32>} : memref<64x128xf32, #tpu.memory_space<vmem>>, vector<64x128xf32>,
    %c1_69 = arith.constant 1 : index
    %c0_70 = arith.constant 0 : index
    %c1_71 = arith.constant 1 : index
    %c0_72 = arith.constant 0 : index
    %56 = vector.load %arg7[%c1_69, %c0_70, %c1_71, %c0_72] : memref<6x1x18x4xf32, #tpu.memory_space<vmem>>, vector<4x1x16x4xf32>
    %57 = vector.shape_cast %56 : vector<4x1x16x4xf32> to vector<4x16x4xf32>
    %58 = vector.shape_cast %57 : vector<4x16x4xf32> to vector<64x4xf32>
    %c1_73 = arith.constant 1 : index
    %c1_74 = arith.constant 1 : index
    %c0_75 = arith.constant 0 : index
    %c0_76 = arith.constant 0 : index
    %59 = vector.load %arg3[%c1_73, %c1_74, %c0_75, %c0_76] : memref<3x3x4x128xf32, #tpu.memory_space<vmem>>, vector<1x1x4x128xf32>
    %60 = vector.shape_cast %59 : vector<1x1x4x128xf32> to vector<4x128xf32>
    %cst_77 = arith.constant dense<0.000000e+00> : vector<64x128xf32>
    %61 = tpu.matmul %58, %60, %cst_77 {dimension_numbers = #tpu.dot_dimension_numbers<[1], [0], [0], [1], [0, 0, 1, 1], [], []>} : vector<64x4xf32>, vector<4x128xf32>, vector<64x128xf32> -> vector<64x128xf32>
    %c0_78 = arith.constant 0 : index
    %c0_79 = arith.constant 0 : index
    %62 = vector.load %arg8[%c0_78, %c0_79] : memref<64x128xf32, #tpu.memory_space<vmem>>, vector<64x128xf32>
    %63 = arith.addf %62, %61 : vector<64x128xf32>
    %c0_80 = arith.constant 0 : index
    %c0_81 = arith.constant 0 : index
    %64 = vector.load %arg8[%c0_80, %c0_81] : memref<64x128xf32, #tpu.memory_space<vmem>>, vector<64x128xf32>
    tpu.vector_store %arg8[%c0_80, %c0_81], %63 {strides = array<i32>} : memref<64x128xf32, #tpu.memory_space<vmem>>, vector<64x128xf32>,
    %c1_82 = arith.constant 1 : index
    %c0_83 = arith.constant 0 : index
    %c2_84 = arith.constant 2 : index
    %c0_85 = arith.constant 0 : index
    %65 = vector.load %arg7[%c1_82, %c0_83, %c2_84, %c0_85] : memref<6x1x18x4xf32, #tpu.memory_space<vmem>>, vector<4x1x16x4xf32>
    %66 = vector.shape_cast %65 : vector<4x1x16x4xf32> to vector<4x16x4xf32>
    %67 = vector.shape_cast %66 : vector<4x16x4xf32> to vector<64x4xf32>
    %c1_86 = arith.constant 1 : index
    %c2_87 = arith.constant 2 : index
    %c0_88 = arith.constant 0 : index
    %c0_89 = arith.constant 0 : index
    %68 = vector.load %arg3[%c1_86, %c2_87, %c0_88, %c0_89] : memref<3x3x4x128xf32, #tpu.memory_space<vmem>>, vector<1x1x4x128xf32>
    %69 = vector.shape_cast %68 : vector<1x1x4x128xf32> to vector<4x128xf32>
    %cst_90 = arith.constant dense<0.000000e+00> : vector<64x128xf32>
    %70 = tpu.matmul %67, %69, %cst_90 {dimension_numbers = #tpu.dot_dimension_numbers<[1], [0], [0], [1], [0, 0, 1, 1], [], []>} : vector<64x4xf32>, vector<4x128xf32>, vector<64x128xf32> -> vector<64x128xf32>
    %c0_91 = arith.constant 0 : index
    %c0_92 = arith.constant 0 : index
    %71 = vector.load %arg8[%c0_91, %c0_92] : memref<64x128xf32, #tpu.memory_space<vmem>>, vector<64x128xf32>
    %72 = arith.addf %71, %70 : vector<64x128xf32>
    %c0_93 = arith.constant 0 : index
    %c0_94 = arith.constant 0 : index
    %73 = vector.load %arg8[%c0_93, %c0_94] : memref<64x128xf32, #tpu.memory_space<vmem>>, vector<64x128xf32>
    tpu.vector_store %arg8[%c0_93, %c0_94], %72 {strides = array<i32>} : memref<64x128xf32, #tpu.memory_space<vmem>>, vector<64x128xf32>,
    %c2_95 = arith.constant 2 : index
    %c0_96 = arith.constant 0 : index
    %c0_97 = arith.constant 0 : index
    %c0_98 = arith.constant 0 : index
    %74 = vector.load %arg7[%c2_95, %c0_96, %c0_97, %c0_98] : memref<6x1x18x4xf32, #tpu.memory_space<vmem>>, vector<4x1x16x4xf32>
    %75 = vector.shape_cast %74 : vector<4x1x16x4xf32> to vector<4x16x4xf32>
    %76 = vector.shape_cast %75 : vector<4x16x4xf32> to vector<64x4xf32>
    %c2_99 = arith.constant 2 : index
    %c0_100 = arith.constant 0 : index
    %c0_101 = arith.constant 0 : index
    %c0_102 = arith.constant 0 : index
    %77 = vector.load %arg3[%c2_99, %c0_100, %c0_101, %c0_102] : memref<3x3x4x128xf32, #tpu.memory_space<vmem>>, vector<1x1x4x128xf32>
    %78 = vector.shape_cast %77 : vector<1x1x4x128xf32> to vector<4x128xf32>
    %cst_103 = arith.constant dense<0.000000e+00> : vector<64x128xf32>
    %79 = tpu.matmul %76, %78, %cst_103 {dimension_numbers = #tpu.dot_dimension_numbers<[1], [0], [0], [1], [0, 0, 1, 1], [], []>} : vector<64x4xf32>, vector<4x128xf32>, vector<64x128xf32> -> vector<64x128xf32>
    %c0_104 = arith.constant 0 : index
    %c0_105 = arith.constant 0 : index
    %80 = vector.load %arg8[%c0_104, %c0_105] : memref<64x128xf32, #tpu.memory_space<vmem>>, vector<64x128xf32>
    %81 = arith.addf %80, %79 : vector<64x128xf32>
    %c0_106 = arith.constant 0 : index
    %c0_107 = arith.constant 0 : index
    %82 = vector.load %arg8[%c0_106, %c0_107] : memref<64x128xf32, #tpu.memory_space<vmem>>, vector<64x128xf32>
    tpu.vector_store %arg8[%c0_106, %c0_107], %81 {strides = array<i32>} : memref<64x128xf32, #tpu.memory_space<vmem>>, vector<64x128xf32>,
    %c2_108 = arith.constant 2 : index
    %c0_109 = arith.constant 0 : index
    %c1_110 = arith.constant 1 : index
    %c0_111 = arith.constant 0 : index
    %83 = vector.load %arg7[%c2_108, %c0_109, %c1_110, %c0_111] : memref<6x1x18x4xf32, #tpu.memory_space<vmem>>, vector<4x1x16x4xf32>
    %84 = vector.shape_cast %83 : vector<4x1x16x4xf32> to vector<4x16x4xf32>
    %85 = vector.shape_cast %84 : vector<4x16x4xf32> to vector<64x4xf32>
    %c2_112 = arith.constant 2 : index
    %c1_113 = arith.constant 1 : index
    %c0_114 = arith.constant 0 : index
    %c0_115 = arith.constant 0 : index
    %86 = vector.load %arg3[%c2_112, %c1_113, %c0_114, %c0_115] : memref<3x3x4x128xf32, #tpu.memory_space<vmem>>, vector<1x1x4x128xf32>
    %87 = vector.shape_cast %86 : vector<1x1x4x128xf32> to vector<4x128xf32>
    %cst_116 = arith.constant dense<0.000000e+00> : vector<64x128xf32>
    %88 = tpu.matmul %85, %87, %cst_116 {dimension_numbers = #tpu.dot_dimension_numbers<[1], [0], [0], [1], [0, 0, 1, 1], [], []>} : vector<64x4xf32>, vector<4x128xf32>, vector<64x128xf32> -> vector<64x128xf32>
    %c0_117 = arith.constant 0 : index
    %c0_118 = arith.constant 0 : index
    %89 = vector.load %arg8[%c0_117, %c0_118] : memref<64x128xf32, #tpu.memory_space<vmem>>, vector<64x128xf32>
    %90 = arith.addf %89, %88 : vector<64x128xf32>
    %c0_119 = arith.constant 0 : index
    %c0_120 = arith.constant 0 : index
    %91 = vector.load %arg8[%c0_119, %c0_120] : memref<64x128xf32, #tpu.memory_space<vmem>>, vector<64x128xf32>
    tpu.vector_store %arg8[%c0_119, %c0_120], %90 {strides = array<i32>} : memref<64x128xf32, #tpu.memory_space<vmem>>, vector<64x128xf32>,
    %c2_121 = arith.constant 2 : index
    %c0_122 = arith.constant 0 : index
    %c2_123 = arith.constant 2 : index
    %c0_124 = arith.constant 0 : index
    %92 = vector.load %arg7[%c2_121, %c0_122, %c2_123, %c0_124] : memref<6x1x18x4xf32, #tpu.memory_space<vmem>>, vector<4x1x16x4xf32>
    %93 = vector.shape_cast %92 : vector<4x1x16x4xf32> to vector<4x16x4xf32>
    %94 = vector.shape_cast %93 : vector<4x16x4xf32> to vector<64x4xf32>
    %c2_125 = arith.constant 2 : index
    %c2_126 = arith.constant 2 : index
    %c0_127 = arith.constant 0 : index
    %c0_128 = arith.constant 0 : index
    %95 = vector.load %arg3[%c2_125, %c2_126, %c0_127, %c0_128] : memref<3x3x4x128xf32, #tpu.memory_space<vmem>>, vector<1x1x4x128xf32>
    %96 = vector.shape_cast %95 : vector<1x1x4x128xf32> to vector<4x128xf32>
    %cst_129 = arith.constant dense<0.000000e+00> : vector<64x128xf32>
    %97 = tpu.matmul %94, %96, %cst_129 {dimension_numbers = #tpu.dot_dimension_numbers<[1], [0], [0], [1], [0, 0, 1, 1], [], []>} : vector<64x4xf32>, vector<4x128xf32>, vector<64x128xf32> -> vector<64x128xf32>
    %c0_130 = arith.constant 0 : index
    %c0_131 = arith.constant 0 : index
    %98 = vector.load %arg8[%c0_130, %c0_131] : memref<64x128xf32, #tpu.memory_space<vmem>>, vector<64x128xf32>
    %99 = arith.addf %98, %97 : vector<64x128xf32>
    %c0_132 = arith.constant 0 : index
    %c0_133 = arith.constant 0 : index
    %100 = vector.load %arg8[%c0_132, %c0_133] : memref<64x128xf32, #tpu.memory_space<vmem>>, vector<64x128xf32>
    tpu.vector_store %arg8[%c0_132, %c0_133], %99 {strides = array<i32>} : memref<64x128xf32, #tpu.memory_space<vmem>>, vector<64x128xf32>,
    %c0_134 = arith.constant 0 : index
    %c0_135 = arith.constant 0 : index
    %101 = vector.load %arg8[%c0_134, %c0_135] : memref<64x128xf32, #tpu.memory_space<vmem>>, vector<64x128xf32>
    %102 = vector.shape_cast %101 : vector<64x128xf32> to vector<4x16x128xf32>
    %c0_136 = arith.constant 0 : index
    %c0_137 = arith.constant 0 : index
    %103 = vector.load %arg4[%c0_136, %c0_137] : memref<1x128xf32, #tpu.memory_space<vmem>>, vector<1x128xf32>
    %104 = vector.shape_cast %103 : vector<1x128xf32> to vector<128xf32>
    %105 = vector.shape_cast %104 : vector<128xf32> to vector<1x1x128xf32>
    %106 = vector.broadcast %105 : vector<1x1x128xf32> to vector<4x16x128xf32>
    %107 = arith.mulf %102, %106 : vector<4x16x128xf32>
    %c0_138 = arith.constant 0 : index
    %c0_139 = arith.constant 0 : index
    %108 = vector.load %arg5[%c0_138, %c0_139] : memref<1x128xf32, #tpu.memory_space<vmem>>, vector<1x128xf32>
    %109 = vector.shape_cast %108 : vector<1x128xf32> to vector<128xf32>
    %110 = vector.shape_cast %109 : vector<128xf32> to vector<1x1x128xf32>
    %111 = vector.broadcast %110 : vector<1x1x128xf32> to vector<4x16x128xf32>
    %112 = arith.addf %107, %111 : vector<4x16x128xf32>
    %cst_140 = arith.constant 0.000000e+00 : f32
    %113 = vector.broadcast %cst_140 : f32 to vector<4x16x128xf32>
    %114 = arith.maximumf %112, %113 : vector<4x16x128xf32>
    %c0_141 = arith.constant 0 : index
    %c0_142 = arith.constant 0 : index
    %c0_143 = arith.constant 0 : index
    %c0_144 = arith.constant 0 : index
    %115 = vector.load %arg6[%c0_141, %c0_142, %c0_143, %c0_144] : memref<1x4x16x128xf32, #tpu.memory_space<vmem>>, vector<1x4x16x128xf32>
    %116 = vector.shape_cast %115 : vector<1x4x16x128xf32> to vector<4x16x128xf32>
    %117 = vector.shape_cast %114 : vector<4x16x128xf32> to vector<1x4x16x128xf32>
    tpu.vector_store %arg6[%c0_141, %c0_142, %c0_143, %c0_144], %117 {strides = array<i32>} : memref<1x4x16x128xf32, #tpu.memory_space<vmem>>, vector<1x4x16x128xf32>,
    return
  }
  func.func @transform_0(%arg0: i32, %arg1: i32) -> (i32, i32, i32, i32, i32) {
    %c0_i32 = arith.constant 0 : i32
    %c0_i32_0 = arith.constant 0 : i32
    %c0_i32_1 = arith.constant 0 : i32
    %c0_i32_2 = arith.constant 0 : i32
    %c0_i32_3 = arith.constant 0 : i32
    return %arg0, %c0_i32, %c0_i32_0, %c0_i32_1, %c0_i32_2 : i32, i32, i32, i32, i32
  }
  func.func @transform_1(%arg0: i32, %arg1: i32) -> (i32, i32, i32, i32) {
    %c0_i32 = arith.constant 0 : i32
    %c0_i32_0 = arith.constant 0 : i32
    %c0_i32_1 = arith.constant 0 : i32
    %c0_i32_2 = arith.constant 0 : i32
    %c0_i32_3 = arith.constant 0 : i32
    return %c0_i32, %c0_i32_0, %c0_i32_1, %c0_i32_2 : i32, i32, i32, i32
  }
  func.func @transform_2(%arg0: i32, %arg1: i32) -> (i32, i32) {
    %c0_i32 = arith.constant 0 : i32
    %c0_i32_0 = arith.constant 0 : i32
    %c0_i32_1 = arith.constant 0 : i32
    return %c0_i32, %c0_i32_0 : i32, i32
  }
  func.func @transform_3(%arg0: i32, %arg1: i32) -> (i32, i32) {
    %c0_i32 = arith.constant 0 : i32
    %c0_i32_0 = arith.constant 0 : i32
    %c0_i32_1 = arith.constant 0 : i32
    return %c0_i32, %c0_i32_0 : i32, i32
  }
  func.func @transform_4(%arg0: i32, %arg1: i32) -> (i32, i32, i32, i32) {
    %c0_i32 = arith.constant 0 : i32
    %c0_i32_0 = arith.constant 0 : i32
    %c0_i32_1 = arith.constant 0 : i32
    return %arg0, %arg1, %c0_i32, %c0_i32_0 : i32, i32, i32, i32
  }
}

</mosaic_0001>

<bundles_post_ra>
// kernel: tpu_custom_call.1
= control target key start
LH: loop header
LB: loop body
LE: loop exit
PB: predicated region body
PF: predicated region fallthrough
CT: control target
= control target key end

     0   :  { %9 = vsyncpa [#allocation5], 0  ;;  %s2831_s0 = inlined_call_operand.vmem [shape: f32[2,16,1,16,4], index: 0, kind: input, shape index: {}]   ;;  %s2832_s1 = inlined_call_operand.vmem [shape: f32[3,3,4,128], index: 1, kind: input, shape index: {}]   ;;  %s2833_s2 = inlined_call_operand.vmem [shape: f32[1,128], index: 2, kind: input, shape index: {}]   ;;  %s2834_s3 = inlined_call_operand.vmem [shape: f32[1,128], index: 3, kind: input, shape index: {}]   ;;  %s2835_s4 = inlined_call_operand.hbm [shape: f32[2,16,16,128], index: 4, kind: output, shape index: {}]  }
   0x1   :  { %11 = vsyncpa [#allocation5 + $0x1], 0  ;;  %s2447_s15 = smov 0   ;;  %s2449_s16 = smov 0  }
   0x2   :  { %s2451_s17 = smov 0   ;;  %s2453_s18 = smov 0  }
   0x3   :  { %s2455_s19 = smov 0   ;;  %s2457_s20 = smov 0  }
   0x4   :  { %s2459_s21 = smov 0   ;;  %s2461_s22 = smov 0  }
   0x5 LB: > { %s1915_s23 = sadd.s32 4294967295, %s2414_s22   ;;  %s1916_s24 = sadd.s32 4294967294, %s2414_s22   ;;  %s2414_s22 = sphi %s2461_s22, %s17_s22   ;;  %s2410_s21 = sphi %s2459_s21, %s2844_s21   ;;  %s2406_s20 = sphi %s2457_s20, %s2843_s20   ;;  %s2402_s19 = sphi %s2455_s19, %s2842_s19   ;;  %s2398_s18 = sphi %s2453_s18, %s2841_s18   ;;  %s2394_s17 = sphi %s2451_s17, %s2840_s17   ;;  %s2390_s16 = sphi %s2449_s16, %s2839_s16   ;;  %s2386_s15 = sphi %s2447_s15, %s2838_s15  }
   0x6   : > { %s26_s25 = sadd.s32 1, %s2406_s20  ;;  %s29_s26 = sadd.s32 1, %s2410_s21 }
   0x7   : > { %p27_p0 = scmp.ge.s32.totalorder %s26_s25, 4  ;;  %p137_p1 = scmp.ne.s32.totalorder %s2394_s17, %s2390_s16 }
   0x8   : > { %p138_p2 = scmp.eq.s32.totalorder %s1915_s23, 7  ;;  %p143_p5 = scmp.ne.s32.totalorder %s2390_s16, %s2386_s15 }
   0x9   : > { %s2846_s25 = smov (%p27_p0, %s26_s25), 0  ;;  %s2848_s26 = smov (!%p27_p0, %s29_s26), %s2410_s21 }
   0xa   : > { %s123_s27 = ssub.s32 %s2406_s20, %s2846_s25  ;;  %p2498_p3 = por %p138_p2, %p137_p1 }
   0xb   : > { %p31_p4 = scmp.ge.s32.totalorder %s2848_s26, 2  ;;  %p144_p6 = scmp.eq.s32.totalorder %s1916_s24, 7 }
   0xc   : > { %p1919_p7 = scmp.ge.s32.totalorder %s2414_s22, 1  ;;  %p179_p9 = scmp.lt.s32.totalorder %s2414_s22, 9 }
   0xd   : > { %s2850_s26 = smov (%p31_p4, %s2848_s26), 0  ;;  %p2507_p8 = por %p144_p6, %p143_p5 }
   0xe   : > { %s122_s30 = ssub.s32 %s2410_s21, %s2850_s26  ;;  %s127_s5 = sadd.s32 1, %s2394_s17 }
   0xf   : > { %s124_s6 = sor.u32 %s123_s27, %s122_s30  ;;  %p180_p10 = pnand %p1919_p7, %p179_p9 }
  0x10   : > { %p125_p11 = scmp.eq.s32.totalorder %s124_s6, 0  ;;  %s202_s8 = sand.u32 (!%p180_p10), 1, %s2390_s16  }
  0x11   : > { %183 = sbr.rel (%p180_p10) target bundleno = 354 (0x162), region = 36  ;;  %s1923_s9 = sshll.u32 (!%p180_p10), %s2398_s18, 2 }
  0x12   : > { %s2516_s7 = scalar_select %p125_p11, %s2394_s17, %s127_s5  }
  0x13   : > { %s2522_s10 = sshll.u32 (!%p180_p10), %s202_s8, 6  ;;  %p205_p12 = scmp.lt.s32.totalorder (!%p180_p10), %s2402_s19, 1 }
  0x14   : > { %s2034_s12 = sshll.u32 (!%p180_p10), %s2398_s18, 6  ;;  %s2552_s30 = scalar_lea.vmem (!%p180_p10), [#allocation4], %s2522_s10 }
  0x15   : > { %p1925_p13 = scmp.ne.s32.totalorder (!%p180_p10), %s2398_s18, 0 }
  0x16   : > { %vm212_vm0 = vcmask 24576   ;;  %v2416_v0 = vmov 0.0   ;;  %s206_s11 = scalar_select %p205_p12, %s2402_s19, 1  ;;  %vm236_vm1 = vcmask 31744  }
  0x17   : > { %213 = vst.msk [vmem:[#allocation2] sm:$0x1] %vm212_vm0, %v2416_v0  ;;  %214 = vst.msk [vmem:[#allocation2 + $0x18] sm:$0x1] %vm212_vm0, %v2416_v0 }
  0x18   : > { %215 = vst.msk [vmem:[#allocation2 + $0x30] sm:$0x1] %vm212_vm0, %v2416_v0  ;;  %216 = vst.msk [vmem:[#allocation2 + $0x48] sm:$0x1] %vm212_vm0, %v2416_v0  ;;  %s2033_s13 = sshll.u32 %s206_s11, 8 }
  0x19   : > { %217 = vst.msk [vmem:[#allocation2 + $0x60] sm:$0x1] %vm212_vm0, %v2416_v0  ;;  %218 = vst.msk [vmem:[#allocation2 + $0x78] sm:$0x1] %vm212_vm0, %v2416_v0  ;;  %s2530_s24 = scalar_lea.vmem %s2831_s0, %s2033_s13 }
  0x1a   : > { %219 = vst.msk [vmem:[#allocation2 + $0x11] sm:$0x1] %vm212_vm0, %v2416_v0  ;;  %220 = vst.msk [vmem:[#allocation2 + $0x29] sm:$0x1] %vm212_vm0, %v2416_v0  ;;  %s2533_s27 = scalar_lea.vmem %s2530_s24, %s2034_s12 }
  0x1b   : > { %221 = vst.msk [vmem:[#allocation2 + $0x41] sm:$0x1] %vm212_vm0, %v2416_v0  ;;  %222 = vst.msk [vmem:[#allocation2 + $0x59] sm:$0x1] %vm212_vm0, %v2416_v0  ;;  %v227_v1 = vld [vmem:[%s2533_s27] sm:$0xff]  ;;  %v228_v2 = vld [vmem:[%s2533_s27 + $0x8] sm:$0xff] }
  0x1c   : > { %223 = vst.msk [vmem:[#allocation2 + $0x71] sm:$0x1] %vm212_vm0, %v2416_v0  ;;  %224 = vst.msk [vmem:[#allocation2 + $0x89] sm:$0x1] %vm212_vm0, %v2416_v0  ;;  %v229_v3 = vld [vmem:[%s2533_s27 + $0x10] sm:$0xff]  ;;  %v230_v4 = vld [vmem:[%s2533_s27 + $0x18] sm:$0xff] }
  0x1d   : > { %237 = vst.msk [vmem:[#allocation2 + $0x19] sm:$0xff] %vm236_vm1, %v227_v1  ;;  %238 = vst.msk [vmem:[#allocation2 + $0x21] sm:$0xff] %vm236_vm1, %v228_v2  ;;  %v231_v5 = vld [vmem:[%s2533_s27 + $0x20] sm:$0xff]  ;;  %v232_v6 = vld [vmem:[%s2533_s27 + $0x28] sm:$0xff]  ;;  %248 = sbr.rel (%p1925_p13) target bundleno = 36 (0x24), region = 40 }
  0x1e   : > { %239 = vst.msk [vmem:[#allocation2 + $0x31] sm:$0xff] %vm236_vm1, %v229_v3  ;;  %240 = vst.msk [vmem:[#allocation2 + $0x39] sm:$0xff] %vm236_vm1, %v230_v4  ;;  %v233_v7 = vld [vmem:[%s2533_s27 + $0x30] sm:$0xff]  ;;  %v234_v8 = vld [vmem:[%s2533_s27 + $0x38] sm:$0xff] }
  0x1f   : > { %241 = vst.msk [vmem:[#allocation2 + $0x49] sm:$0xff] %vm236_vm1, %v231_v5  ;;  %242 = vst.msk [vmem:[#allocation2 + $0x51] sm:$0xff] %vm236_vm1, %v232_v6 }
  0x20   : > { %243 = vst.msk [vmem:[#allocation2 + $0x61] sm:$0xff] %vm236_vm1, %v233_v7  ;;  %244 = vst.msk [vmem:[#allocation2 + $0x69] sm:$0xff] %vm236_vm1, %v234_v8 }
  0x22   : > { %v2417_v9 = vmov 0.0  }
  0x23   : > { %249 = vst.msk [vmem:[#allocation2 + $0x1] sm:$0xff] %vm236_vm1, %v2417_v9  ;;  %250 = vst.msk [vmem:[#allocation2 + $0x9] sm:$0xff] %vm236_vm1, %v2417_v9 }
  0x24 PF: > { %p1926_p0 = scmp.le.s32.totalorder %s2398_s18, 0 }
  0x25   : > { %s1927_s5 = sadd.s32 (!%p1926_p0), 4294967295, %s1923_s9 }
  0x26   : > { %254 = sbr.rel (%p1926_p0) target bundleno = 45 (0x2d), region = 44  ;;  %s1928_s6 = sshll.u32 (!%p1926_p0), %s1927_s5, 4 }
  0x27   : > { %s257_s11 = scalar_lea.vmem (!%p1926_p0), %s2530_s24, %s1928_s6 }
  0x2b   : > { %v258_v10 = vld [vmem:[%s257_s11] sm:$0xff]  ;;  %v259_v11 = vld [vmem:[%s257_s11 + $0x8] sm:$0xff] }
  0x2c   : > { %260 = vst.msk [vmem:[#allocation2 + $0x1] sm:$0xff] %vm236_vm1, %v258_v10  ;;  %261 = vst.msk [vmem:[#allocation2 + $0x9] sm:$0xff] %vm236_vm1, %v259_v11 }
  0x2d PF: > { %p1929_p1 = scmp.ne.s32.totalorder %s2398_s18, 3 }
  0x2f   : > { %265 = sbr.rel (%p1929_p1) target bundleno = 54 (0x36), region = 48 }
  0x34   : > { %v2418_v12 = vmov 0.0  }
  0x35   : > { %267 = vst.msk [vmem:[#allocation2 + $0x79] sm:$0xff] %vm236_vm1, %v2418_v12  ;;  %268 = vst.msk [vmem:[#allocation2 + $0x81] sm:$0xff] %vm236_vm1, %v2418_v12 }
  0x36 PF: > { %p1930_p2 = scmp.ge.s32.totalorder %s2398_s18, 3 }
  0x38   : > { %272 = sbr.rel (%p1930_p2) target bundleno = 63 (0x3f), region = 52 }
  0x3d   : > { %v1933_v13 = vld [vmem:[%s2533_s27 + $0x40] sm:$0xff]  ;;  %v1934_v14 = vld [vmem:[%s2533_s27 + $0x48] sm:$0xff] }
  0x3e   : > { %279 = vst.msk [vmem:[#allocation2 + $0x79] sm:$0xff] %vm236_vm1, %v1933_v13  ;;  %280 = vst.msk [vmem:[#allocation2 + $0x81] sm:$0xff] %vm236_vm1, %v1934_v14 }
  0x3f PF: > { %v289_v15 = vld [vmem:[%s2832_s1] sm:$0xf]  ;;  %vm314_vm2 = vcmask 1043456   ;;  %v2574_v16 = vld [vmem:[#allocation2 + $0x30] sm:$0xff]  ;;  %v2578_v18 = vld [vmem:[#allocation2 + $0x38] sm:$0xff]  ;;  %s2036_s9 = sshll.u32 %s2398_s18, 3 }
  0x40   : > { %v281_v17 = vld [vmem:[#allocation2] sm:$0xff]  ;;  %2244 = vmatprep.subr.msk.mxu1 %vm314_vm2, %v289_v15  ;;  %2118 = vmatprep.subr.msk.mxu0 %vm314_vm2, %v289_v15  ;;  %v282_v20 = vld [vmem:[#allocation2 + $0x8] sm:$0xff]  ;;  %v283_v23 = vld [vmem:[#allocation2 + $0x18] sm:$0xff]  ;;  %s2029_s10 = sshll.u32 %s2402_s19, 5  ;;  %s1831_s19 = sshll.u32 %s2552_s30, 4  ;;  %s2774_s19 = int_to_ptr.vmem [resolvable:$true] %s1831_s19 }
  0x41   : > { %v1944_v19 = vld [vmem:[%s2832_s1 + $0x4] sm:$0xf]  ;;  %2245 = vmatpush3.msk.msra.mxu1 %vm314_vm2, %v289_v15  ;;  %2126 = vmatprep.mubr.msk.f32.mxu1 %vm236_vm1, %v2574_v16  ;;  %v1954_v21 = vld [vmem:[%s2832_s1 + $0x8] sm:$0xf]  ;;  %v2598_v24 = vld [vmem:[#allocation2 + $0x50] sm:$0xff]  ;;  %s1828_s12 = sadd.s32 %s2036_s9, %s2029_s10  ;;  %s2780_s24 = scalar_lea.sflag [#allocation5], %s202_s8 }
  0x42   : > { %2119 = vmatpush3.msk.msra.mxu0 %vm314_vm2, %v289_v15  ;;  %2120 = vmatprep.mubr.msk.f32.mxu0 %vm236_vm1, %v281_v17  ;;  %v2591_v22 = vld [vmem:[#allocation2 + $0x48] sm:$0xff]  ;;  %v284_v26 = vld [vmem:[#allocation2 + $0x20] sm:$0xff]  ;;  %v1974_v29 = vld [vmem:[%s2832_s1 + $0x10] sm:$0xf]  ;;  %s2030_s18 = sshll.u32 %s1828_s12, 7  ;;  %s2322_s27 = scalar_lea.vmem %s2774_s19, 1024 }
  0x43   : > { %2127 = vmatmul.mubr.msk.f32.vlgmr.msra.gmra.mxu1 %vm236_vm1, %v2578_v18  ;;  %2132 = vmatprep.subr.msk.mxu1 %vm314_vm2, %v1944_v19  ;;  %v1964_v25 = vld [vmem:[%s2832_s1 + $0xc] sm:$0xf]  ;;  %v431_v27 = vld [vmem:[#allocation2 + $0x1] sm:$0xff]  ;;  %v433_v32 = vld [vmem:[#allocation2 + $0x19] sm:$0xff]  ;;  %s2772_s23 = scalar_lea.hbm %s2835_s4, %s2030_s18  ;;  %p2323_p4 = scmp.ne.s32.totalorder %s2774_s19, %s2322_s27 }
  0x44   : > { %2121 = vmatmul.mubr.msk.f32.vlgmr.msra.gmra.mxu0 %vm236_vm1, %v282_v20  ;;  %2133 = vmatpush3.msk.msra.mxu1 %vm314_vm2, %v1944_v19  ;;  %v597_v28 = vld [vmem:[#allocation2 + $0x2] sm:$0xff]  ;;  %v598_v31 = vld [vmem:[#allocation2 + $0xa] sm:$0xff]  ;;  %v599_v33 = vld [vmem:[#allocation2 + $0x1a] sm:$0xff]  ;;  %s2419_s5 = smov [#allocation4]  }
  0x45   : > { %2146 = vmatprep.subr.msk.mxu0 %vm314_vm2, %v1954_v21  ;;  %2129 = vmatprep.mubr.msk.f32.mxu1 %vm236_vm1, %v2591_v22  ;;  %v432_v30 = vld [vmem:[#allocation2 + $0x9] sm:$0xff]  ;;  %v1984_v34 = vld [vmem:[%s2832_s1 + $0x14] sm:$0xf]  ;;  %v434_v35 = vld [vmem:[#allocation2 + $0x21] sm:$0xff]  ;;  %p2324_p5 = pnand %p2323_p4, %p2498_p3  ;;  %s2326_s6 = sshll.u32 %s2419_s5, 4  ;;  %s2327_s6 = int_to_ptr.vmem [resolvable:$false] %s2326_s6 }
  0x46   : > { %2147 = vmatpush3.msk.msra.mxu0 %vm314_vm2, %v1954_v21  ;;  %2123 = vmatprep.mubr.msk.f32.mxu0 %vm236_vm1, %v283_v23  ;;  %v1994_v36 = vld [vmem:[%s2832_s1 + $0x18] sm:$0xf]  ;;  %v600_v37 = vld [vmem:[#allocation2 + $0x22] sm:$0xff]  ;;  %v603_v43 = vld [vmem:[#allocation2 + $0x4a] sm:$0xff]  ;;  %s2328_s11 = scalar_lea.vmem %s2327_s6, 2048  ;;  %p2329_p7 = scmp.lt.s32.totalorder %s2774_s19, %s2327_s6 }
  0x47   : > { %2130 = vmatmul.mubr.msk.f32.gmra.mxu1 %vm236_vm1, %v2598_v24  ;;  %2160 = vmatprep.subr.msk.mxu1 %vm314_vm2, %v1964_v25  ;;  %v2629_v38 = vld [vmem:[#allocation2 + $0x31] sm:$0xff]  ;;  %v2640_v40 = vld [vmem:[#allocation2 + $0x39] sm:$0xff]  ;;  %v437_v42 = vld [vmem:[#allocation2 + $0x49] sm:$0xff]  ;;  %p2325_p6 = pneg %p2324_p5  ;;  %p2330_p9 = scmp.lt.s32.totalorder %s2328_s11, %s2322_s27 }
  0x48   : > { %2124 = vmatmul.mubr.msk.f32.gmra.mxu0 %vm236_vm1, %v284_v26  ;;  %2134 = vmatprep.mubr.msk.f32.mxu1 %vm236_vm1, %v431_v27  ;;  %v2632_v39 = vld [vmem:[#allocation2 + $0x32] sm:$0xff]  ;;  %v602_v41 = vld [vmem:[#allocation2 + $0x3a] sm:$0xff]  ;;  %v770_v50 = vld [vmem:[#allocation2 + $0x68] sm:$0xff] }
  0x49   : > { %2148 = vmatprep.mubr.msk.f32.mxu0 %vm236_vm1, %v597_v28  ;;  %2174 = vmatprep.subr.msk.mxu0 %vm314_vm2, %v1974_v29  ;;  %v438_v44 = vld [vmem:[#allocation2 + $0x51] sm:$0xff]  ;;  %v2004_v46 = vld [vmem:[%s2832_s1 + $0x1c] sm:$0xf]  ;;  %v2014_v47 = vld [vmem:[%s2832_s1 + $0x20] sm:$0xf]  ;;  %p2331_p10 = por %p2330_p9, %p2329_p7 }
  0x4a   : > { %v604_v45 = vld [vmem:[#allocation2 + $0x52] sm:$0xff]  ;;  %v769_v48 = vld [vmem:[#allocation2 + $0x60] sm:$0xff]  ;;  %v936_v51 = vld [vmem:[#allocation2 + $0x69] sm:$0xff] }
  0x4b   : > { %2135 = vmatmul.mubr.msk.f32.vlgmr.msra.gmra.mxu1 %vm236_vm1, %v432_v30  ;;  %v935_v49 = vld [vmem:[#allocation2 + $0x61] sm:$0xff]  ;;  %v1268_v53 = vld [vmem:[#allocation2 + $0x78] sm:$0xff]  ;;  %v1102_v54 = vld [vmem:[#allocation2 + $0x6a] sm:$0xff]  ;;  %p2332_p11 = pnand %p2331_p10, %p2325_p6 }
  0x4c   : > { %2149 = vmatmul.mubr.msk.f32.vlgmr.msra.gmra.mxu0 %vm236_vm1, %v598_v31  ;;  %2161 = vmatpush3.msk.msra.mxu1 %vm314_vm2, %v1964_v25  ;;  %v1101_v52 = vld [vmem:[#allocation2 + $0x62] sm:$0xff]  ;;  %v1434_v56 = vld [vmem:[#allocation2 + $0x79] sm:$0xff] }
  0x4d   : > { %2137 = vmatprep.mubr.msk.f32.mxu1 %vm236_vm1, %v433_v32  ;;  %2175 = vmatpush3.msk.msra.mxu0 %vm314_vm2, %v1974_v29  ;;  %v1269_v55 = vld [vmem:[#allocation2 + $0x80] sm:$0xff] }
  0x4e   : > { %2151 = vmatprep.mubr.msk.f32.mxu0 %vm236_vm1, %v599_v33  ;;  %2188 = vmatprep.subr.msk.mxu1 %vm314_vm2, %v1984_v34  ;;  %v1600_v57 = vld [vmem:[#allocation2 + $0x7a] sm:$0xff]  ;;  %v1601_v59 = vld [vmem:[#allocation2 + $0x82] sm:$0xff] }
  0x4f   : > { %2138 = vmatmul.mubr.msk.f32.gmra.mxu1 %vm236_vm1, %v434_v35  ;;  %2202 = vmatprep.subr.msk.mxu0 %vm314_vm2, %v1994_v36  ;;  %v1435_v58 = vld [vmem:[#allocation2 + $0x81] sm:$0xff] }
  0x50   : > { %2152 = vmatmul.mubr.msk.f32.gmra.mxu0 %vm236_vm1, %v600_v37  ;;  %2140 = vmatprep.mubr.msk.f32.mxu1 %vm236_vm1, %v2629_v38 }
  0x51   : > { %2154 = vmatprep.mubr.msk.f32.mxu0 %vm236_vm1, %v2632_v39 }
  0x53   : > { %2141 = vmatmul.mubr.msk.f32.gmra.mxu1 %vm236_vm1, %v2640_v40 }
  0x54   : > { %2155 = vmatmul.mubr.msk.f32.gmra.mxu0 %vm236_vm1, %v602_v41  ;;  %2143 = vmatprep.mubr.msk.f32.mxu1 %vm236_vm1, %v437_v42 }
  0x55   : > { %2157 = vmatprep.mubr.msk.f32.mxu0 %vm236_vm1, %v603_v43 }
  0x57   : > { %2144 = vmatmul.mubr.msk.f32.gmra.mxu1 %vm236_vm1, %v438_v44 }
  0x58   : > { %2158 = vmatmul.mubr.msk.f32.gmra.mxu0 %vm236_vm1, %v604_v45  ;;  %2162 = vmatprep.mubr.msk.f32.mxu1 %vm236_vm1, %v283_v23 }
  0x59   : > { %2176 = vmatprep.mubr.msk.f32.mxu0 %vm236_vm1, %v433_v32 }
  0x5b   : > { %2163 = vmatmul.mubr.msk.f32.vlgmr.msra.gmra.mxu1 %vm236_vm1, %v284_v26 }
  0x5c   : > { %2177 = vmatmul.mubr.msk.f32.vlgmr.msra.gmra.mxu0 %vm236_vm1, %v434_v35  ;;  %2189 = vmatpush3.msk.msra.mxu1 %vm314_vm2, %v1984_v34 }
  0x5d   : > { %2165 = vmatprep.mubr.msk.f32.mxu1 %vm236_vm1, %v2574_v16  ;;  %2203 = vmatpush3.msk.msra.mxu0 %vm314_vm2, %v1994_v36 }
  0x5e   : > { %2179 = vmatprep.mubr.msk.f32.mxu0 %vm236_vm1, %v2629_v38  ;;  %2216 = vmatprep.subr.msk.mxu1 %vm314_vm2, %v2004_v46 }
  0x5f   : > { %2166 = vmatmul.mubr.msk.f32.gmra.mxu1 %vm236_vm1, %v2578_v18  ;;  %2230 = vmatprep.subr.msk.mxu0 %vm314_vm2, %v2014_v47 }
  0x60   : > { %2180 = vmatmul.mubr.msk.f32.gmra.mxu0 %vm236_vm1, %v2640_v40  ;;  %2168 = vmatprep.mubr.msk.f32.mxu1 %vm236_vm1, %v2591_v22 }
  0x61   : > { %2182 = vmatprep.mubr.msk.f32.mxu0 %vm236_vm1, %v437_v42 }
  0x63   : > { %2169 = vmatmul.mubr.msk.f32.gmra.mxu1 %vm236_vm1, %v2598_v24 }
  0x64   : > { %2183 = vmatmul.mubr.msk.f32.gmra.mxu0 %vm236_vm1, %v438_v44  ;;  %2171 = vmatprep.mubr.msk.f32.mxu1 %vm236_vm1, %v769_v48 }
  0x65   : > { %2185 = vmatprep.mubr.msk.f32.mxu0 %vm236_vm1, %v935_v49 }
  0x67   : > { %2172 = vmatmul.mubr.msk.f32.gmra.mxu1 %vm236_vm1, %v770_v50 }
  0x68   : > { %2186 = vmatmul.mubr.msk.f32.gmra.mxu0 %vm236_vm1, %v936_v51  ;;  %2190 = vmatprep.mubr.msk.f32.mxu1 %vm236_vm1, %v599_v33 }
  0x69   : > { %2204 = vmatprep.mubr.msk.f32.mxu0 %vm236_vm1, %v2574_v16 }
  0x6b   : > { %2191 = vmatmul.mubr.msk.f32.vlgmr.msra.gmra.mxu1 %vm236_vm1, %v600_v37 }
  0x6c   : > { %2205 = vmatmul.mubr.msk.f32.vlgmr.msra.gmra.mxu0 %vm236_vm1, %v2578_v18  ;;  %2217 = vmatpush3.msk.msra.mxu1 %vm314_vm2, %v2004_v46 }
  0x6d   : > { %2193 = vmatprep.mubr.msk.f32.mxu1 %vm236_vm1, %v2632_v39  ;;  %2231 = vmatpush3.msk.msra.mxu0 %vm314_vm2, %v2014_v47 }
  0x6e   : > { %2207 = vmatprep.mubr.msk.f32.mxu0 %vm236_vm1, %v2591_v22 }
  0x6f   : > { %2194 = vmatmul.mubr.msk.f32.gmra.mxu1 %vm236_vm1, %v602_v41 }
  0x70   : > { %2208 = vmatmul.mubr.msk.f32.gmra.mxu0 %vm236_vm1, %v2598_v24  ;;  %2196 = vmatprep.mubr.msk.f32.mxu1 %vm236_vm1, %v603_v43 }
  0x71   : > { %2210 = vmatprep.mubr.msk.f32.mxu0 %vm236_vm1, %v769_v48 }
  0x73   : > { %2197 = vmatmul.mubr.msk.f32.gmra.mxu1 %vm236_vm1, %v604_v45 }
  0x74   : > { %2211 = vmatmul.mubr.msk.f32.gmra.mxu0 %vm236_vm1, %v770_v50  ;;  %2199 = vmatprep.mubr.msk.f32.mxu1 %vm236_vm1, %v1101_v52 }
  0x75   : > { %2213 = vmatprep.mubr.msk.f32.mxu0 %vm236_vm1, %v1268_v53 }
  0x77   : > { %2200 = vmatmul.mubr.msk.f32.gmra.mxu1 %vm236_vm1, %v1102_v54 }
  0x78   : > { %2214 = vmatmul.mubr.msk.f32.gmra.mxu0 %vm236_vm1, %v1269_v55  ;;  %2218 = vmatprep.mubr.msk.f32.mxu1 %vm236_vm1, %v2629_v38 }
  0x79   : > { %2232 = vmatprep.mubr.msk.f32.mxu0 %vm236_vm1, %v2632_v39 }
  0x7b   : > { %2219 = vmatmul.mubr.msk.f32.vlgmr.msra.gmra.mxu1 %vm236_vm1, %v2640_v40 }
  0x7c   : > { %2233 = vmatmul.mubr.msk.f32.vlgmr.msra.gmra.mxu0 %vm236_vm1, %v602_v41  ;;  %2221 = vmatprep.mubr.msk.f32.mxu1 %vm236_vm1, %v437_v42 }
  0x7d   : > { %2235 = vmatprep.mubr.msk.f32.mxu0 %vm236_vm1, %v603_v43 }
  0x7f   : > { %2222 = vmatmul.mubr.msk.f32.gmra.mxu1 %vm236_vm1, %v438_v44 }
  0x80   : > { %2236 = vmatmul.mubr.msk.f32.gmra.mxu0 %vm236_vm1, %v604_v45  ;;  %2224 = vmatprep.mubr.msk.f32.mxu1 %vm236_vm1, %v935_v49 }
  0x81   : > { %2238 = vmatprep.mubr.msk.f32.mxu0 %vm236_vm1, %v1101_v52 }
  0x83   : > { %2225 = vmatmul.mubr.msk.f32.gmra.mxu1 %vm236_vm1, %v936_v51 }
  0x84   : > { %2239 = vmatmul.mubr.msk.f32.gmra.mxu0 %vm236_vm1, %v1102_v54  ;;  %2227 = vmatprep.mubr.msk.f32.mxu1 %vm236_vm1, %v1434_v56 }
  0x85   : > { %2241 = vmatprep.mubr.msk.f32.mxu0 %vm236_vm1, %v1600_v57 }
  0x87   : > { %2228 = vmatmul.mubr.msk.f32.gmra.mxu1 %vm236_vm1, %v1435_v58 }
  0x88   : > { %2242 = vmatmul.mubr.msk.f32.gmra.mxu0 %vm236_vm1, %v1601_v59 }
 0x103   : > { %v2128_v60 = vpop.f32.mrf.mxu1 }
 0x104   : > { %v2122_v61 = vpop.f32.mrf.mxu0 }
 0x105   : > { %v404_v62 = vpop.f32.mrf.mxu1 }
 0x106   : > { %v384_v63 = vpop.f32.mrf.mxu0 }
 0x107   : > { %v2131_v0 = vpop.f32.mrf.mxu1 }
 0x108   : > { %v2125_v1 = vpop.f32.mrf.mxu0 }
 0x109   : > { %v2725_v2 = vpop.f32.mrf.mxu1 }
 0x10a   : > { %v394_v3 = vpop.f32.mrf.mxu0 }
 0x10b   : > { %v2136_v4 = vpop.f32.mrf.mxu1 }
 0x10c   : > { %v2150_v5 = vpop.f32.mrf.mxu0  ;;  %v582_v35 = vadd.f32 %v2136_v4, %v2122_v61 }
 0x10d   : > { %v534_v6 = vpop.f32.mrf.mxu1 }
 0x10e   : > { %v700_v7 = vpop.f32.mrf.mxu0  ;;  %v581_v38 = vadd.f32 %v534_v6, %v384_v63  ;;  %v748_v41 = vadd.f32 %v2150_v5, %v582_v35 }
 0x10f   : > { %v2139_v8 = vpop.f32.mrf.mxu1 }
 0x110   : > { %v2153_v9 = vpop.f32.mrf.mxu0  ;;  %v584_v42 = vadd.f32 %v2139_v8, %v2125_v1  ;;  %v747_v45 = vadd.f32 %v700_v7, %v581_v38 }
 0x111   : > { %v544_v10 = vpop.f32.mrf.mxu1 }
 0x112   : > { %v710_v11 = vpop.f32.mrf.mxu0  ;;  %v583_v46 = vadd.f32 %v544_v10, %v394_v3  ;;  %v750_v50 = vadd.f32 %v2153_v9, %v584_v42 }
 0x113   : > { %v2142_v12 = vpop.f32.mrf.mxu1 }
 0x114   : > { %v2156_v13 = vpop.f32.mrf.mxu0  ;;  %v586_v53 = vadd.f32 %v2142_v12, %v2128_v60  ;;  %v749_v56 = vadd.f32 %v710_v11, %v583_v46 }
 0x115   : > { %v554_v14 = vpop.f32.mrf.mxu1 }
 0x116   : > { %v720_v15 = vpop.f32.mrf.mxu0  ;;  %v585_v54 = vadd.f32 %v554_v14, %v404_v62  ;;  %v752_v3 = vadd.f32 %v2156_v13, %v586_v53 }
 0x117   : > { %v2145_v16 = vpop.f32.mrf.mxu1 }
 0x118   : > { %v2159_v17 = vpop.f32.mrf.mxu0  ;;  %v588_v61 = vadd.f32 %v2145_v16, %v2131_v0  ;;  %v751_v7 = vadd.f32 %v720_v15, %v585_v54 }
 0x119   : > { %v564_v18 = vpop.f32.mrf.mxu1 }
 0x11a   : > { %v730_v19 = vpop.f32.mrf.mxu0  ;;  %v587_v8 = vadd.f32 %v564_v18, %v2725_v2  ;;  %v754_v62 = vadd.f32 %v2159_v17, %v588_v61  ;;  %v2735_v17 = vld [vmem:[%s2833_s2] ss:$0 sm:$0xff] }
 0x11b   : > { %v2164_v20 = vpop.f32.mrf.mxu1 }
 0x11c   : > { %v2178_v21 = vpop.f32.mrf.mxu0  ;;  %v914_v47 = vadd.f32 %v2164_v20, %v748_v41 }
 0x11d   : > { %v866_v22 = vpop.f32.mrf.mxu1 }
 0x11e   : > { %v1032_v23 = vpop.f32.mrf.mxu0  ;;  %v913_v51 = vadd.f32 %v866_v22, %v747_v45  ;;  %v1080_v57 = vadd.f32 %v2178_v21, %v914_v47 }
 0x11f   : > { %v2167_v24 = vpop.f32.mrf.mxu1 }
 0x120   : > { %v2181_v25 = vpop.f32.mrf.mxu0  ;;  %v916_v58 = vadd.f32 %v2167_v24, %v750_v50  ;;  %v1079_v1 = vadd.f32 %v1032_v23, %v913_v51  ;;  %v753_v23 = vadd.f32 %v730_v19, %v587_v8 }
 0x121   : > { %v876_v26 = vpop.f32.mrf.mxu1 }
 0x122   : > { %v1042_v27 = vpop.f32.mrf.mxu0  ;;  %v915_v4 = vadd.f32 %v876_v26, %v749_v56  ;;  %v1082_v10 = vadd.f32 %v2181_v25, %v916_v58 }
 0x123   : > { %v2170_v28 = vpop.f32.mrf.mxu1 }
 0x124   : > { %v2184_v29 = vpop.f32.mrf.mxu0  ;;  %v918_v12 = vadd.f32 %v2170_v28, %v752_v3  ;;  %v1081_v21 = vadd.f32 %v1042_v27, %v915_v4 }
 0x125   : > { %v886_v30 = vpop.f32.mrf.mxu1 }
 0x126   : > { %v1052_v31 = vpop.f32.mrf.mxu0  ;;  %v917_v11 = vadd.f32 %v886_v30, %v751_v7  ;;  %v1084_v2 = vadd.f32 %v2184_v29, %v918_v12  ;;  %v2741_v29 = vld [vmem:[%s2834_s3] ss:$0 sm:$0xff] }
 0x127   : > { %v2173_v32 = vpop.f32.mrf.mxu1 }
 0x128   : > { %v2727_v33 = vpop.f32.mrf.mxu0  ;;  %v920_v24 = vadd.f32 %v2173_v32, %v754_v62  ;;  %v1083_v18 = vadd.f32 %v1052_v31, %v917_v11 }
 0x129   : > { %v896_v34 = vpop.f32.mrf.mxu1 }
 0x12a   : > { %v2729_v36 = vpop.f32.mrf.mxu0  ;;  %v919_v25 = vadd.f32 %v896_v34, %v753_v23  ;;  %v1086_v19 = vadd.f32 %v2727_v33, %v920_v24 }
 0x12b   : > { %v2192_v37 = vpop.f32.mrf.mxu1 }
 0x12c   : > { %v2206_v39 = vpop.f32.mrf.mxu0  ;;  %v1246_v5 = vadd.f32 %v2192_v37, %v1080_v57  ;;  %v1085_v45 = vadd.f32 %v2729_v36, %v919_v25 }
 0x12d   : > { %v1198_v40 = vpop.f32.mrf.mxu1 }
 0x12e   : > { %v1365_v43 = vpop.f32.mrf.mxu0  ;;  %v1245_v20 = vadd.f32 %v1198_v40, %v1079_v1  ;;  %v1413_v22 = vadd.f32 %v2206_v39, %v1246_v5 }
 0x12f   : > { %v2195_v44 = vpop.f32.mrf.mxu1 }
 0x130   : > { %v2209_v48 = vpop.f32.mrf.mxu0  ;;  %v1248_v0 = vadd.f32 %v2195_v44, %v1082_v10  ;;  %v1412_v35 = vadd.f32 %v1365_v43, %v1245_v20 }
 0x131   : > { %v1208_v49 = vpop.f32.mrf.mxu1 }
 0x132   : > { %v1375_v52 = vpop.f32.mrf.mxu0  ;;  %v1247_v13 = vadd.f32 %v1208_v49, %v1081_v21  ;;  %v1415_v27 = vadd.f32 %v2209_v48, %v1248_v0 }
 0x133   : > { %v2198_v55 = vpop.f32.mrf.mxu1 }
 0x134   : > { %v2212_v59 = vpop.f32.mrf.mxu0  ;;  %v1250_v32 = vadd.f32 %v2198_v55, %v1084_v2  ;;  %v1414_v34 = vadd.f32 %v1375_v52, %v1247_v13 }
 0x135   : > { %v1218_v63 = vpop.f32.mrf.mxu1 }
 0x136   : > { %v1385_v6 = vpop.f32.mrf.mxu0  ;;  %v1249_v40 = vadd.f32 %v1218_v63, %v1083_v18  ;;  %v1417_v53 = vadd.f32 %v2212_v59, %v1250_v32 }
 0x137   : > { %v2201_v9 = vpop.f32.mrf.mxu1 }
 0x138   : > { %v2215_v60 = vpop.f32.mrf.mxu0  ;;  %v1252_v46 = vadd.f32 %v2201_v9, %v1086_v19  ;;  %v1416_v54 = vadd.f32 %v1385_v6, %v1249_v40 }
 0x139   : > { %v1228_v14 = vpop.f32.mrf.mxu1 }
 0x13a   : > { %v1395_v16 = vpop.f32.mrf.mxu0  ;;  %v1251_v52 = vadd.f32 %v1228_v14, %v1085_v45  ;;  %v1419_v63 = vadd.f32 %v2215_v60, %v1252_v46 }
 0x13b   : > { %v2220_v26 = vpop.f32.mrf.mxu1 }
 0x13c   : > { %v1579_v15 = vadd.f32 %v2220_v26, %v1413_v22  ;;  %v2234_v37 = vpop.f32.mrf.mxu0  ;;  %v1418_v8 = vadd.f32 %v1395_v16, %v1251_v52 }
 0x13d   : > { %v1531_v28 = vpop.f32.mrf.mxu1 }
 0x13e   : > { %v1745_v30 = vadd.f32 %v2234_v37, %v1579_v15  ;;  %v1578_v38 = vadd.f32 %v1531_v28, %v1412_v35  ;;  %v1697_v39 = vpop.f32.mrf.mxu0 }
 0x13f   : > { %v2223_v31 = vpop.f32.mrf.mxu1 }
 0x140   : > { %v1776_v41 = vmul.f32 %v2735_v17, %v1745_v30  ;;  %v1744_v42 = vadd.f32 %v1697_v39, %v1578_v38  ;;  %v1581_v43 = vadd.f32 %v2223_v31, %v1415_v27  ;;  %v2237_v44 = vpop.f32.mrf.mxu0 }
 0x141   : > { %v1541_v47 = vpop.f32.mrf.mxu1 }
 0x142   : > { %v1791_v33 = vadd.f32 %v2741_v29, %v1776_v41  ;;  %v1775_v48 = vmul.f32 %v2735_v17, %v1744_v42  ;;  %v1747_v49 = vadd.f32 %v2237_v44, %v1581_v43  ;;  %v1580_v50 = vadd.f32 %v1541_v47, %v1414_v34  ;;  %v1707_v51 = vpop.f32.mrf.mxu0 }
 0x143   : > { %v2226_v55 = vpop.f32.mrf.mxu1 }
 0x144   : > { %v1799_v56 = vmax.f32 %v1791_v33, 0.0  ;;  %v1790_v57 = vadd.f32 %v2741_v29, %v1775_v48  ;;  %v1778_v36 = vmul.f32 %v2735_v17, %v1747_v49  ;;  %v1746_v58 = vadd.f32 %v1707_v51, %v1580_v50  ;;  %v2240_v61 = vpop.f32.mrf.mxu0 }
 0x145   : > { %v1583_v1 = vadd.f32 %v2226_v55, %v1417_v53  ;;  %v1551_v4 = vpop.f32.mrf.mxu1 }
 0x146   : > { %1807 = vst [vmem:[%s2552_s30 + $0x8] sm:$0xff] %v1799_v56  ;;  %v1798_v5 = vmax.f32 %v1790_v57, 0.0  ;;  %v1793_v59 = vadd.f32 %v2741_v29, %v1778_v36  ;;  %v1777_v6 = vmul.f32 %v2735_v17, %v1746_v58  ;;  %v1582_v3 = vadd.f32 %v1551_v4, %v1416_v54  ;;  %v1717_v7 = vpop.f32.mrf.mxu0 }
 0x147   : > { %v1749_v9 = vadd.f32 %v2240_v61, %v1583_v1  ;;  %v2229_v10 = vpop.f32.mrf.mxu1 }
 0x148   : > { %1806 = vst [vmem:[%s2552_s30] sm:$0xff] %v1798_v5  ;;  %v1801_v20 = vmax.f32 %v1793_v59, 0.0  ;;  %v1792_v60 = vadd.f32 %v2741_v29, %v1777_v6  ;;  %v1748_v62 = vadd.f32 %v1717_v7, %v1582_v3  ;;  %v1585_v12 = vadd.f32 %v2229_v10, %v1419_v63  ;;  %v2243_v11 = vpop.f32.mrf.mxu0 }
 0x149   : > { %v1780_v14 = vmul.f32 %v2735_v17, %v1749_v9  ;;  %v1561_v21 = vpop.f32.mrf.mxu1 }
 0x14a   : > { %1809 = vst [vmem:[%s2552_s30 + $0x18] sm:$0xff] %v1801_v20  ;;  %v1800_v22 = vmax.f32 %v1792_v60, 0.0  ;;  %v1779_v0 = vmul.f32 %v2735_v17, %v1748_v62  ;;  %v1751_v16 = vadd.f32 %v2243_v11, %v1585_v12  ;;  %v1584_v23 = vadd.f32 %v1561_v21, %v1418_v8  ;;  %v1727_v26 = vpop.f32.mrf.mxu0 }
 0x14b   : > { %v1795_v24 = vadd.f32 %v2741_v29, %v1780_v14 }
 0x14c   : > { %1808 = vst [vmem:[%s2552_s30 + $0x10] sm:$0xff] %v1800_v22  ;;  %v1794_v35 = vadd.f32 %v2741_v29, %v1779_v0  ;;  %v1782_v13 = vmul.f32 %v2735_v17, %v1751_v16  ;;  %v1750_v15 = vadd.f32 %v1727_v26, %v1584_v23 }
 0x14d   : > { %v1803_v37 = vmax.f32 %v1795_v24, 0.0 }
 0x14e   : > { %v1802_v2 = vmax.f32 %v1794_v35, 0.0  ;;  %v1797_v18 = vadd.f32 %v2741_v29, %v1782_v13  ;;  %v1781_v25 = vmul.f32 %v2735_v17, %v1750_v15 }
 0x14f   : > { %1811 = vst [vmem:[%s2552_s30 + $0x28] sm:$0xff] %v1803_v37 }
 0x150   : > { %1810 = vst [vmem:[%s2552_s30 + $0x20] sm:$0xff] %v1802_v2  ;;  %v1805_v28 = vmax.f32 %v1797_v18, 0.0  ;;  %v1796_v27 = vadd.f32 %v2741_v29, %v1781_v25 }
 0x152   : > { %1813 = vst [vmem:[%s2552_s30 + $0x38] sm:$0xff] %v1805_v28  ;;  %v1804_v30 = vmax.f32 %v1796_v27, 0.0 }
 0x154   : > { %1812 = vst [vmem:[%s2552_s30 + $0x30] sm:$0xff] %v1804_v30 }
 0x155   : > { %2335 = shalt.err (!%p2332_p11)
}
 0x156   : > { %s2336_s8 = scalar_lea.hbm %s2772_s23, 1024  ;;  %s2340_s10 = scalar_lea.hbm %s2835_s4, 8192 }
 0x157   : > { %p2337_p12 = scmp.ne.s32.totalorder %s2772_s23, %s2336_s8  ;;  %p2341_p1 = scmp.lt.s32.totalorder %s2772_s23, %s2835_s4 }
 0x158   : > { %p2342_p2 = scmp.lt.s32.totalorder %s2340_s10, %s2336_s8 }
 0x159   : > { %p2338_p13 = pnand %p2337_p12, %p2498_p3 }
 0x15a   : > { %p2343_p4 = por %p2342_p2, %p2341_p1 }
 0x15b   : > { %p2339_p0 = pneg %p2338_p13 }
 0x15d   : > { %p2344_p5 = pnand %p2343_p4, %p2339_p0 }
 0x15f   : > { %2347 = shalt.err (!%p2344_p5)
}
 0x160   : > { %s2420_s13 = smov 128   ;;  %s2421_s14 = smov 8  }
 0x161   : > { %2246 = dma.vmem_to_hbm [thread:$0]  (%p2498_p3), %s2774_s19, 1024, %s2772_s23, %s2780_s24, %s2420_s13, %s2420_s13, %s2421_s14  }
 0x162 PF: > { %p2252_p6 = scmp.ge.s32.totalorder %s2414_s22, 2  ;;  %s1846_s27 = sand.u32 1, %s2386_s15  }
 0x163   : > { %s1847_s5 = scalar_lea.sflag [#allocation5], %s1846_s27 }
 0x164   : > { %p2249_p7 = pnand %p2252_p6, %p2507_p8 }
 0x166   : > { %p2250_p9 = pneg %p2249_p7 }
 0x168   : > { %2381 = dma.done.wait (%p2250_p9), %s1847_s5, 1024  }
 0x169   : > { %2383 = vsyncadd (%p2250_p9), %s1847_s5, 4294966272  ;;  %s17_s22 = sadd.s32 1, %s2414_s22   ;;  %s2838_s15 = smov %s2390_s16 }
 0x16a   : > { %p14_p10 = scmp.ge.s32.totalorder %s17_s22, 10   ;;  %s2839_s16 = smov %s2394_s17 }
 0x16b   : > { %s2840_s17 = smov %s2516_s7  ;;  %s2841_s18 = smov %s2406_s20 }
 0x16c   : > { %s2842_s19 = smov %s2410_s21  ;;  %s2843_s20 = smov %s2846_s25 }
 0x16d   : > { %s2844_s21 = smov %s2850_s26  ;;  %16 = sbr.rel (!%p14_p10) target bundleno = 5 (0x5), region = 102 }
 0x172   :  { %1852 = vsyncpa [#allocation5], 1 }
 0x173   :  { %1854 = vsyncpa [#allocation5 + $0x1], 1 }

</bundles_post_ra>
